<compile_context>
chip_gen: v7x
topology: tpu7x:2x2x1
jax: 0.10.0
libtpu: 0.0.40
codegen_flags: <defaults>
</compile_context>

<pallas_src>
import functools

import jax
import jax.numpy as jnp
from jax.experimental import pallas as pl
from jax.experimental.pallas import tpu as pltpu

BN_EPS = 1e-5

# (context_size, dilation) for frame1..frame5, fixed by TDNN_v5.__init__
# (stride defaults to [1,1,1,1]).  Static Python constants.
FRAME_META = ((5, 1), (3, 2), (3, 3), (1, 1), (1, 1))


# ----------------------------- fused kernel -----------------------------------

def _tdnn_v5_fused_kernel(x_ref,
                          w1_ref, bb1_ref, w2_ref, bb2_ref, w3_ref, bb3_ref,
                          w4_ref, bb4_ref, w5_ref, bb5_ref,
                          w6_ref, bb6_ref, w7_ref, bb7_ref,
                          wc_ref, bc_ref,
                          logits_ref, emb_ref):
    # One grid step == one utterance (grid=(B,), "parallel").
    # x_ref:  (1, T, C_in)   bf16
    # w*_ref: (K*C_in, C_out) bf16 (BN scale folded in)
    # bb*_ref: (2, C_out)    f32  -- row0 = conv/linear bias * BN scale, row1 = BN shift
    # wc_ref: (E, NC_pad)    bf16 ; bc_ref: (1, NC_pad) f32
    # logits_ref: (1, 1, NC_pad) f32 ; emb_ref: (1, 1, E) f32
    f32, bf16 = jnp.float32, jnp.bfloat16

    def frame(x2d, w_ref, bb_ref, context, dilation):
        # Conv1d(K, dil, stride=1, pad=0) + bias + ReLU + BN(eval) shift,
        # K taps folded into the contraction => one MXU matmul per layer.
        T_in = x2d.shape[0]
        T_out = T_in - dilation * (context - 1)
        if context == 1:
            xs = x2d
        else:
            taps = [x2d[k * dilation: k * dilation + T_out, :] for k in range(context)]
            xs = jnp.concatenate(taps, axis=-1)                 # (T_out, K*C_in)
        z = jnp.dot(xs, w_ref[...], preferred_element_type=f32)  # MXU, f32 acc
        return jnp.maximum(z + bb_ref[0:1, :], 0.0) + bb_ref[1:2, :]

    x = x_ref[0]                                                 # (T, C_in) bf16
    y = frame(x, w1_ref, bb1_ref, *FRAME_META[0]).astype(bf16)   # frame1
    y = frame(y, w2_ref, bb2_ref, *FRAME_META[1]).astype(bf16)   # frame2
    y = frame(y, w3_ref, bb3_ref, *FRAME_META[2]).astype(bf16)   # frame3
    y4 = frame(y, w4_ref, bb4_ref, 1, 1).astype(bf16)            # frame4 (1x1)
    y5 = frame(y4, w5_ref, bb5_ref, 1, 1)                        # frame5 (1x1), f32

    # Statistic pooling (STAP): one-pass mean / unbiased std (torch.std default).
    T3 = y5.shape[0]
    s1 = jnp.sum(y5, axis=0, keepdims=True)                      # (1, C5)
    s2 = jnp.sum(y5 * y5, axis=0, keepdims=True)                 # (1, C5)
    mean = s1 * (1.0 / T3)
    # clamp at 0: guards against f32 cancellation producing tiny negatives
    var = jnp.maximum((s2 - mean * s1) * (1.0 / max(T3 - 1, 1)), 0.0)
    pooled = jnp.concatenate([mean, jnp.sqrt(var)], axis=-1)     # (1, 2*C5)

    # segment6: Linear + ReLU + BN (scale folded)
    a = jnp.dot(pooled.astype(bf16), w6_ref[...], preferred_element_type=f32)
    a = jnp.maximum(a + bb6_ref[0:1, :], 0.0) + bb6_ref[1:2, :]
    # segment7: Linear + ReLU + BN (scale folded) -> embedding_b
    emb = jnp.dot(a.astype(bf16), w7_ref[...], preferred_element_type=f32)
    emb = jnp.maximum(emb + bb7_ref[0:1, :], 0.0) + bb7_ref[1:2, :]
    # classifier (columns zero-padded to a lane-dense multiple of 128)
    logits = jnp.dot(emb.astype(bf16), wc_ref[...], preferred_element_type=f32) + bc_ref[...]

    emb_ref[0] = emb
    logits_ref[0] = logits


def tdnn_v5_forward(x, p, *, num_classes):
    # input_mask == identity; proser is None so mixup branches never fire;
    # dropout_layer=False so drop is skipped; alpha=0 so no L2_Norm.
    B, T, C_in = x.shape
    frames = p["frames"]
    w6, bb6 = p["segment6"]
    w7, bb7 = p["segment7"]
    wc, bc = p["classifier"]
    E = w7.shape[1]
    NCp = wc.shape[1]

    def whole(a):  # grid-invariant, whole-array block (DMA'd once, stays in VMEM)
        return pl.BlockSpec(a.shape, lambda b, _nd=a.ndim: (0,) * _nd)

    flat_inputs = [x.astype(jnp.bfloat16)]
    in_specs = [pl.BlockSpec((1, T, C_in), lambda b: (b, 0, 0))]
    for w, bb in frames:
        flat_inputs += [w, bb]
        in_specs += [whole(w), whole(bb)]
    flat_inputs += [w6, bb6, w7, bb7, wc, bc]
    in_specs += [whole(w6), whole(bb6), whole(w7), whole(bb7), whole(wc), whole(bc)]

    logits3, emb3 = pl.pallas_call(
        _tdnn_v5_fused_kernel,
        out_shape=(jax.ShapeDtypeStruct((B, 1, NCp), jnp.float32),
                   jax.ShapeDtypeStruct((B, 1, E), jnp.float32)),
        grid=(B,),
        in_specs=in_specs,
        out_specs=(pl.BlockSpec((1, 1, NCp), lambda b: (b, 0, 0)),
                   pl.BlockSpec((1, 1, E), lambda b: (b, 0, 0))),
        compiler_params=pltpu.CompilerParams(dimension_semantics=("parallel",)),
    )(*flat_inputs)
    return logits3[:, 0, :num_classes], emb3[:, 0, :]


# ----------------------------- Parameters -------------------------------------

def init_params(key, input_dim, channels, embedding_size, num_classes):
    bn_scale = float((1.0 + BN_EPS) ** -0.5)   # eval-mode BN, fresh stats; > 0 so
                                               # folding into W/b commutes with ReLU.
    frame_io = [
        (input_dim,   channels[0]),
        (channels[0], channels[1]),
        (channels[1], channels[2]),
        (channels[2], channels[3]),
        (channels[3], channels[4]),
    ]
    keys = jax.random.split(key, 16)
    ki = 0
    frames = []
    for (cin, cout), (K, _dil) in zip(frame_io, FRAME_META):
        # kaiming_normal_ fan_out: std = sqrt(2 / (C_out * K))
        w = jax.random.normal(keys[ki], (K, cin, cout), jnp.float32) * (2.0 / (cout * K)) ** 0.5
        ki += 1
        bound = (cin * K) ** -0.5
        b = jax.random.uniform(keys[ki], (cout,), jnp.float32, -bound, bound)
        ki += 1
        w_folded = (w * bn_scale).reshape(K * cin, cout).astype(jnp.bfloat16)
        # merged epilogue constants: row0 = bias*scale, row1 = BN shift (0 here)
        bb = jnp.stack([b * bn_scale, jnp.zeros((cout,), jnp.float32)], axis=0)
        frames.append((w_folded, bb))

    def linear_bn(kw, kb, din, dout):
        bound = din ** -0.5
        w = jax.random.uniform(kw, (din, dout), jnp.float32, -bound, bound)
        b = jax.random.uniform(kb, (dout,), jnp.float32, -bound, bound)
        bb = jnp.stack([b * bn_scale, jnp.zeros((dout,), jnp.float32)], axis=0)
        return ((w * bn_scale).astype(jnp.bfloat16), bb)

    enc_out = channels[4] * 2   # STAP: mean || std
    seg6 = linear_bn(keys[ki], keys[ki + 1], enc_out, 512); ki += 2
    seg7 = linear_bn(keys[ki], keys[ki + 1], 512, embedding_size); ki += 2

    # classifier (no BN), zero-padded to a lane-dense multiple of 128 columns
    nc_pad = ((num_classes + 127) // 128) * 128
    bound = embedding_size ** -0.5
    wc = jax.random.uniform(keys[ki], (embedding_size, num_classes), jnp.float32, -bound, bound)
    bc = jax.random.uniform(keys[ki + 1], (num_classes,), jnp.float32, -bound, bound)
    wc_pad = jnp.zeros((embedding_size, nc_pad), jnp.float32).at[:, :num_classes].set(wc)
    bc_pad = jnp.zeros((1, nc_pad), jnp.float32).at[0, :num_classes].set(bc)

    return {"frames": frames, "segment6": seg6, "segment7": seg7,
            "classifier": (wc_pad.astype(jnp.bfloat16), bc_pad)}


# ----------------------------- pure-JAX reference ------------------------------
# Mirrors the kernel's precision choices (bf16 operands, f32 accumulation) so the
# comparison isolates kernel plumbing rather than bf16 rounding.

def ref_forward(x, p, *, num_classes):
    f32, bf16 = jnp.float32, jnp.bfloat16
    x = x.astype(bf16)
    frames = p["frames"]
    for (w, bb), (K, dil) in zip(frames[:3], FRAME_META[:3]):
        T_out = x.shape[1] - dil * (K - 1)
        taps = [x[:, k * dil: k * dil + T_out, :] for k in range(K)]
        xs = jnp.concatenate(taps, axis=-1).astype(f32)
        z = jnp.einsum("btc,cd->btd", xs, w.astype(f32))
        x = (jnp.maximum(z + bb[0], 0.0) + bb[1]).astype(bf16)

    (w4, bb4), (w5, bb5) = frames[3], frames[4]
    y4 = jnp.einsum("btc,cd->btd", x.astype(f32), w4.astype(f32))
    y4 = jnp.maximum(y4 + bb4[0], 0.0) + bb4[1]
    y5 = jnp.einsum("btc,cd->btd", y4.astype(bf16).astype(f32), w5.astype(f32))
    y5 = jnp.maximum(y5 + bb5[0], 0.0) + bb5[1]
    T = y5.shape[1]
    mean = y5.sum(axis=1) / T
    std = jnp.sqrt(((y5 - mean[:, None, :]) ** 2).sum(axis=1) / max(T - 1, 1))
    pooled = jnp.concatenate([mean, std], axis=1)

    def drb(v, w, bb):
        z = v.astype(bf16).astype(f32) @ w.astype(f32)
        return jnp.maximum(z + bb[0], 0.0) + bb[1]

    a = drb(pooled, *p["segment6"])
    emb = drb(a, *p["segment7"])
    wc, bc = p["classifier"]
    logits = emb.astype(bf16).astype(f32) @ wc.astype(f32) + bc
    return logits[:, :num_classes], emb


# ----------------------------- main --------------------------------------------

if __name__ == "__main__":
    key = jax.random.PRNGKey(0)
    k_param, k_x = jax.random.split(key)

    # Small, lane-dense config consistent with TDNN_v5(num_classes, embedding_size,
    # input_dim, channels=[...]).  T=46 so frame3's output length (T-14=32) is a
    # multiple of 8 sublanes.
    B, T, INPUT_DIM = 2, 46, 64
    CHANNELS = [128, 128, 128, 128, 128]
    EMBEDDING_SIZE = 128
    NUM_CLASSES = 10

    params = init_params(k_param, INPUT_DIM, CHANNELS, EMBEDDING_SIZE, NUM_CLASSES)
    x = jax.random.normal(k_x, (B, T, INPUT_DIM), jnp.float32)

    fwd = jax.jit(functools.partial(tdnn_v5_forward, num_classes=NUM_CLASSES))
    logits, emb = fwd(x, params)
    jax.block_until_ready((logits, emb))

    ref_logits, ref_emb = ref_forward(x, params, num_classes=NUM_CLASSES)
    assert logits.shape == (B, NUM_CLASSES) and emb.shape == (B, EMBEDDING_SIZE)
    assert jnp.allclose(emb, ref_emb, atol=2e-2, rtol=2e-2), \
        float(jnp.max(jnp.abs(emb - ref_emb)))
    assert jnp.allclose(logits, ref_logits, atol=2e-2, rtol=2e-2), \
        float(jnp.max(jnp.abs(logits - ref_logits)))

    print("KERNEL_OK")
</pallas_src>

<mosaic_0001>
module attributes {stable_mosaic.version = 11 : i64} {
  func.func @_tdnn_v5_fused_kernel(%arg0: i32, %arg1: memref<1x46x64xbf16, #tpu.memory_space<vmem>>, %arg2: memref<320x128xbf16, #tpu.memory_space<vmem>>, %arg3: memref<2x128xf32, #tpu.memory_space<vmem>>, %arg4: memref<384x128xbf16, #tpu.memory_space<vmem>>, %arg5: memref<2x128xf32, #tpu.memory_space<vmem>>, %arg6: memref<384x128xbf16, #tpu.memory_space<vmem>>, %arg7: memref<2x128xf32, #tpu.memory_space<vmem>>, %arg8: memref<128x128xbf16, #tpu.memory_space<vmem>>, %arg9: memref<2x128xf32, #tpu.memory_space<vmem>>, %arg10: memref<128x128xbf16, #tpu.memory_space<vmem>>, %arg11: memref<2x128xf32, #tpu.memory_space<vmem>>, %arg12: memref<256x512xbf16, #tpu.memory_space<vmem>>, %arg13: memref<2x512xf32, #tpu.memory_space<vmem>>, %arg14: memref<512x128xbf16, #tpu.memory_space<vmem>>, %arg15: memref<2x128xf32, #tpu.memory_space<vmem>>, %arg16: memref<128x128xbf16, #tpu.memory_space<vmem>>, %arg17: memref<1x128xf32, #tpu.memory_space<vmem>>, %arg18: memref<1x1x128xf32, #tpu.memory_space<vmem>>, %arg19: memref<1x1x128xf32, #tpu.memory_space<vmem>>) attributes {dimension_semantics = [#tpu.dimension_semantics<parallel>], iteration_bounds = array<i64: 2>, scalar_prefetch = 0 : i64, scratch_operands = 0 : i64, tpu.core_type = #tpu.core_type<tc>, window_params = [{transform_indices = @transform_0, window_bounds = array<i64: 1, 46, 64>}, {pipeline_mode = #tpu.pipeline_mode<synchronous>, transform_indices = @transform_1, window_bounds = array<i64: 320, 128>}, {pipeline_mode = #tpu.pipeline_mode<synchronous>, transform_indices = @transform_2, window_bounds = array<i64: 2, 128>}, {pipeline_mode = #tpu.pipeline_mode<synchronous>, transform_indices = @transform_3, window_bounds = array<i64: 384, 128>}, {pipeline_mode = #tpu.pipeline_mode<synchronous>, transform_indices = @transform_4, window_bounds = array<i64: 2, 128>}, {pipeline_mode = #tpu.pipeline_mode<synchronous>, transform_indices = @transform_5, window_bounds = array<i64: 384, 128>}, {pipeline_mode = #tpu.pipeline_mode<synchronous>, transform_indices = @transform_6, window_bounds = array<i64: 2, 128>}, {pipeline_mode = #tpu.pipeline_mode<synchronous>, transform_indices = @transform_7, window_bounds = array<i64: 128, 128>}, {pipeline_mode = #tpu.pipeline_mode<synchronous>, transform_indices = @transform_8, window_bounds = array<i64: 2, 128>}, {pipeline_mode = #tpu.pipeline_mode<synchronous>, transform_indices = @transform_9, window_bounds = array<i64: 128, 128>}, {pipeline_mode = #tpu.pipeline_mode<synchronous>, transform_indices = @transform_10, window_bounds = array<i64: 2, 128>}, {pipeline_mode = #tpu.pipeline_mode<synchronous>, transform_indices = @transform_11, window_bounds = array<i64: 256, 512>}, {pipeline_mode = #tpu.pipeline_mode<synchronous>, transform_indices = @transform_12, window_bounds = array<i64: 2, 512>}, {pipeline_mode = #tpu.pipeline_mode<synchronous>, transform_indices = @transform_13, window_bounds = array<i64: 512, 128>}, {pipeline_mode = #tpu.pipeline_mode<synchronous>, transform_indices = @transform_14, window_bounds = array<i64: 2, 128>}, {pipeline_mode = #tpu.pipeline_mode<synchronous>, transform_indices = @transform_15, window_bounds = array<i64: 128, 128>}, {pipeline_mode = #tpu.pipeline_mode<synchronous>, transform_indices = @transform_16, window_bounds = array<i64: 1, 128>}, {transform_indices = @transform_17, window_bounds = array<i64: 1, 1, 128>}, {transform_indices = @transform_18, window_bounds = array<i64: 1, 1, 128>}]} {
    %c0 = arith.constant 0 : index
    %c0_0 = arith.constant 0 : index
    %c0_1 = arith.constant 0 : index
    %0 = vector.load %arg1[%c0, %c0_0, %c0_1] : memref<1x46x64xbf16, #tpu.memory_space<vmem>>, vector<1x46x64xbf16>
    %1 = vector.shape_cast %0 : vector<1x46x64xbf16> to vector<46x64xbf16>
    %2 = vector.extract_strided_slice %1 {offsets = [0, 0], sizes = [42, 64], strides = [1, 1]} : vector<46x64xbf16> to vector<42x64xbf16>
    %3 = vector.extract_strided_slice %1 {offsets = [1, 0], sizes = [42, 64], strides = [1, 1]} : vector<46x64xbf16> to vector<42x64xbf16>
    %4 = vector.extract_strided_slice %1 {offsets = [2, 0], sizes = [42, 64], strides = [1, 1]} : vector<46x64xbf16> to vector<42x64xbf16>
    %5 = vector.extract_strided_slice %1 {offsets = [3, 0], sizes = [42, 64], strides = [1, 1]} : vector<46x64xbf16> to vector<42x64xbf16>
    %6 = vector.extract_strided_slice %1 {offsets = [4, 0], sizes = [42, 64], strides = [1, 1]} : vector<46x64xbf16> to vector<42x64xbf16>
    %7 = tpu.concatenate %2, %3, %4, %5, %6 in 1 : vector<42x64xbf16>, vector<42x64xbf16>, vector<42x64xbf16>, vector<42x64xbf16>, vector<42x64xbf16> -> vector<42x320xbf16>
    %c0_2 = arith.constant 0 : index
    %c0_3 = arith.constant 0 : index
    %8 = vector.load %arg2[%c0_2, %c0_3] : memref<320x128xbf16, #tpu.memory_space<vmem>>, vector<320x128xbf16>
    %cst = arith.constant dense<0.000000e+00> : vector<42x128xf32>
    %9 = tpu.matmul %7, %8, %cst {dimension_numbers = #tpu.dot_dimension_numbers<[1], [0], [0], [1], [0, 0, 1, 1], [], []>} : vector<42x320xbf16>, vector<320x128xbf16>, vector<42x128xf32> -> vector<42x128xf32>
    %c0_4 = arith.constant 0 : index
    %c0_5 = arith.constant 0 : index
    %10 = vector.load %arg3[%c0_4, %c0_5] : memref<2x128xf32, #tpu.memory_space<vmem>>, vector<1x128xf32>
    %11 = vector.broadcast %10 : vector<1x128xf32> to vector<42x128xf32>
    %12 = arith.addf %9, %11 : vector<42x128xf32>
    %cst_6 = arith.constant 0.000000e+00 : f32
    %13 = vector.broadcast %cst_6 : f32 to vector<42x128xf32>
    %14 = arith.maximumf %12, %13 : vector<42x128xf32>
    %c1 = arith.constant 1 : index
    %c0_7 = arith.constant 0 : index
    %15 = vector.load %arg3[%c1, %c0_7] : memref<2x128xf32, #tpu.memory_space<vmem>>, vector<1x128xf32>
    %16 = vector.broadcast %15 : vector<1x128xf32> to vector<42x128xf32>
    %17 = arith.addf %14, %16 : vector<42x128xf32>
    %18 = arith.truncf %17 : vector<42x128xf32> to vector<42x128xbf16>
    %19 = vector.extract_strided_slice %18 {offsets = [0, 0], sizes = [38, 128], strides = [1, 1]} : vector<42x128xbf16> to vector<38x128xbf16>
    %20 = vector.extract_strided_slice %18 {offsets = [2, 0], sizes = [38, 128], strides = [1, 1]} : vector<42x128xbf16> to vector<38x128xbf16>
    %21 = vector.extract_strided_slice %18 {offsets = [4, 0], sizes = [38, 128], strides = [1, 1]} : vector<42x128xbf16> to vector<38x128xbf16>
    %22 = tpu.concatenate %19, %20, %21 in 1 : vector<38x128xbf16>, vector<38x128xbf16>, vector<38x128xbf16> -> vector<38x384xbf16>
    %c0_8 = arith.constant 0 : index
    %c0_9 = arith.constant 0 : index
    %23 = vector.load %arg4[%c0_8, %c0_9] : memref<384x128xbf16, #tpu.memory_space<vmem>>, vector<384x128xbf16>
    %cst_10 = arith.constant dense<0.000000e+00> : vector<38x128xf32>
    %24 = tpu.matmul %22, %23, %cst_10 {dimension_numbers = #tpu.dot_dimension_numbers<[1], [0], [0], [1], [0, 0, 1, 1], [], []>} : vector<38x384xbf16>, vector<384x128xbf16>, vector<38x128xf32> -> vector<38x128xf32>
    %c0_11 = arith.constant 0 : index
    %c0_12 = arith.constant 0 : index
    %25 = vector.load %arg5[%c0_11, %c0_12] : memref<2x128xf32, #tpu.memory_space<vmem>>, vector<1x128xf32>
    %26 = vector.broadcast %25 : vector<1x128xf32> to vector<38x128xf32>
    %27 = arith.addf %24, %26 : vector<38x128xf32>
    %cst_13 = arith.constant 0.000000e+00 : f32
    %28 = vector.broadcast %cst_13 : f32 to vector<38x128xf32>
    %29 = arith.maximumf %27, %28 : vector<38x128xf32>
    %c1_14 = arith.constant 1 : index
    %c0_15 = arith.constant 0 : index
    %30 = vector.load %arg5[%c1_14, %c0_15] : memref<2x128xf32, #tpu.memory_space<vmem>>, vector<1x128xf32>
    %31 = vector.broadcast %30 : vector<1x128xf32> to vector<38x128xf32>
    %32 = arith.addf %29, %31 : vector<38x128xf32>
    %33 = arith.truncf %32 : vector<38x128xf32> to vector<38x128xbf16>
    %34 = vector.extract_strided_slice %33 {offsets = [0, 0], sizes = [32, 128], strides = [1, 1]} : vector<38x128xbf16> to vector<32x128xbf16>
    %35 = vector.extract_strided_slice %33 {offsets = [3, 0], sizes = [32, 128], strides = [1, 1]} : vector<38x128xbf16> to vector<32x128xbf16>
    %36 = vector.extract_strided_slice %33 {offsets = [6, 0], sizes = [32, 128], strides = [1, 1]} : vector<38x128xbf16> to vector<32x128xbf16>
    %37 = tpu.concatenate %34, %35, %36 in 1 : vector<32x128xbf16>, vector<32x128xbf16>, vector<32x128xbf16> -> vector<32x384xbf16>
    %c0_16 = arith.constant 0 : index
    %c0_17 = arith.constant 0 : index
    %38 = vector.load %arg6[%c0_16, %c0_17] : memref<384x128xbf16, #tpu.memory_space<vmem>>, vector<384x128xbf16>
    %cst_18 = arith.constant dense<0.000000e+00> : vector<32x128xf32>
    %39 = tpu.matmul %37, %38, %cst_18 {dimension_numbers = #tpu.dot_dimension_numbers<[1], [0], [0], [1], [0, 0, 1, 1], [], []>} : vector<32x384xbf16>, vector<384x128xbf16>, vector<32x128xf32> -> vector<32x128xf32>
    %c0_19 = arith.constant 0 : index
    %c0_20 = arith.constant 0 : index
    %40 = vector.load %arg7[%c0_19, %c0_20] : memref<2x128xf32, #tpu.memory_space<vmem>>, vector<1x128xf32>
    %41 = vector.broadcast %40 : vector<1x128xf32> to vector<32x128xf32>
    %42 = arith.addf %39, %41 : vector<32x128xf32>
    %cst_21 = arith.constant 0.000000e+00 : f32
    %43 = vector.broadcast %cst_21 : f32 to vector<32x128xf32>
    %44 = arith.maximumf %42, %43 : vector<32x128xf32>
    %c1_22 = arith.constant 1 : index
    %c0_23 = arith.constant 0 : index
    %45 = vector.load %arg7[%c1_22, %c0_23] : memref<2x128xf32, #tpu.memory_space<vmem>>, vector<1x128xf32>
    %46 = vector.broadcast %45 : vector<1x128xf32> to vector<32x128xf32>
    %47 = arith.addf %44, %46 : vector<32x128xf32>
    %48 = arith.truncf %47 : vector<32x128xf32> to vector<32x128xbf16>
    %c0_24 = arith.constant 0 : index
    %c0_25 = arith.constant 0 : index
    %49 = vector.load %arg8[%c0_24, %c0_25] : memref<128x128xbf16, #tpu.memory_space<vmem>>, vector<128x128xbf16>
    %cst_26 = arith.constant dense<0.000000e+00> : vector<32x128xf32>
    %50 = tpu.matmul %48, %49, %cst_26 {dimension_numbers = #tpu.dot_dimension_numbers<[1], [0], [0], [1], [0, 0, 1, 1], [], []>} : vector<32x128xbf16>, vector<128x128xbf16>, vector<32x128xf32> -> vector<32x128xf32>
    %c0_27 = arith.constant 0 : index
    %c0_28 = arith.constant 0 : index
    %51 = vector.load %arg9[%c0_27, %c0_28] : memref<2x128xf32, #tpu.memory_space<vmem>>, vector<1x128xf32>
    %52 = vector.broadcast %51 : vector<1x128xf32> to vector<32x128xf32>
    %53 = arith.addf %50, %52 : vector<32x128xf32>
    %cst_29 = arith.constant 0.000000e+00 : f32
    %54 = vector.broadcast %cst_29 : f32 to vector<32x128xf32>
    %55 = arith.maximumf %53, %54 : vector<32x128xf32>
    %c1_30 = arith.constant 1 : index
    %c0_31 = arith.constant 0 : index
    %56 = vector.load %arg9[%c1_30, %c0_31] : memref<2x128xf32, #tpu.memory_space<vmem>>, vector<1x128xf32>
    %57 = vector.broadcast %56 : vector<1x128xf32> to vector<32x128xf32>
    %58 = arith.addf %55, %57 : vector<32x128xf32>
    %59 = arith.truncf %58 : vector<32x128xf32> to vector<32x128xbf16>
    %c0_32 = arith.constant 0 : index
    %c0_33 = arith.constant 0 : index
    %60 = vector.load %arg10[%c0_32, %c0_33] : memref<128x128xbf16, #tpu.memory_space<vmem>>, vector<128x128xbf16>
    %cst_34 = arith.constant dense<0.000000e+00> : vector<32x128xf32>
    %61 = tpu.matmul %59, %60, %cst_34 {dimension_numbers = #tpu.dot_dimension_numbers<[1], [0], [0], [1], [0, 0, 1, 1], [], []>} : vector<32x128xbf16>, vector<128x128xbf16>, vector<32x128xf32> -> vector<32x128xf32>
    %c0_35 = arith.constant 0 : index
    %c0_36 = arith.constant 0 : index
    %62 = vector.load %arg11[%c0_35, %c0_36] : memref<2x128xf32, #tpu.memory_space<vmem>>, vector<1x128xf32>
    %63 = vector.broadcast %62 : vector<1x128xf32> to vector<32x128xf32>
    %64 = arith.addf %61, %63 : vector<32x128xf32>
    %cst_37 = arith.constant 0.000000e+00 : f32
    %65 = vector.broadcast %cst_37 : f32 to vector<32x128xf32>
    %66 = arith.maximumf %64, %65 : vector<32x128xf32>
    %c1_38 = arith.constant 1 : index
    %c0_39 = arith.constant 0 : index
    %67 = vector.load %arg11[%c1_38, %c0_39] : memref<2x128xf32, #tpu.memory_space<vmem>>, vector<1x128xf32>
    %68 = vector.broadcast %67 : vector<1x128xf32> to vector<32x128xf32>
    %69 = arith.addf %66, %68 : vector<32x128xf32>
    %cst_40 = arith.constant dense<0.000000e+00> : vector<128xf32>
    %70 = vector.multi_reduction <add>, %69, %cst_40 [0] : vector<32x128xf32> to vector<128xf32>
    %71 = vector.shape_cast %70 : vector<128xf32> to vector<1x128xf32>
    %72 = arith.mulf %69, %69 : vector<32x128xf32>
    %cst_41 = arith.constant dense<0.000000e+00> : vector<128xf32>
    %73 = vector.multi_reduction <add>, %72, %cst_41 [0] : vector<32x128xf32> to vector<128xf32>
    %74 = vector.shape_cast %73 : vector<128xf32> to vector<1x128xf32>
    %cst_42 = arith.constant 3.125000e-02 : f32
    %75 = vector.broadcast %cst_42 : f32 to vector<1x128xf32>
    %76 = arith.mulf %71, %75 : vector<1x128xf32>
    %77 = arith.mulf %76, %71 : vector<1x128xf32>
    %78 = arith.subf %74, %77 : vector<1x128xf32>
    %cst_43 = arith.constant 0.0322580636 : f32
    %79 = vector.broadcast %cst_43 : f32 to vector<1x128xf32>
    %80 = arith.mulf %78, %79 : vector<1x128xf32>
    %cst_44 = arith.constant 0.000000e+00 : f32
    %81 = vector.broadcast %cst_44 : f32 to vector<1x128xf32>
    %82 = arith.maximumf %80, %81 : vector<1x128xf32>
    %83 = math.sqrt %82 : vector<1x128xf32>
    %84 = tpu.concatenate %76, %83 in 1 : vector<1x128xf32>, vector<1x128xf32> -> vector<1x256xf32>
    %85 = arith.truncf %84 : vector<1x256xf32> to vector<1x256xbf16>
    %c0_45 = arith.constant 0 : index
    %c0_46 = arith.constant 0 : index
    %86 = vector.load %arg12[%c0_45, %c0_46] : memref<256x512xbf16, #tpu.memory_space<vmem>>, vector<256x512xbf16>
    %cst_47 = arith.constant dense<0.000000e+00> : vector<1x512xf32>
    %87 = tpu.matmul %85, %86, %cst_47 {dimension_numbers = #tpu.dot_dimension_numbers<[1], [0], [0], [1], [0, 0, 1, 1], [], []>} : vector<1x256xbf16>, vector<256x512xbf16>, vector<1x512xf32> -> vector<1x512xf32>
    %c0_48 = arith.constant 0 : index
    %c0_49 = arith.constant 0 : index
    %88 = vector.load %arg13[%c0_48, %c0_49] : memref<2x512xf32, #tpu.memory_space<vmem>>, vector<1x512xf32>
    %89 = arith.addf %87, %88 : vector<1x512xf32>
    %cst_50 = arith.constant 0.000000e+00 : f32
    %90 = vector.broadcast %cst_50 : f32 to vector<1x512xf32>
    %91 = arith.maximumf %89, %90 : vector<1x512xf32>
    %c1_51 = arith.constant 1 : index
    %c0_52 = arith.constant 0 : index
    %92 = vector.load %arg13[%c1_51, %c0_52] : memref<2x512xf32, #tpu.memory_space<vmem>>, vector<1x512xf32>
    %93 = arith.addf %91, %92 : vector<1x512xf32>
    %94 = arith.truncf %93 : vector<1x512xf32> to vector<1x512xbf16>
    %c0_53 = arith.constant 0 : index
    %c0_54 = arith.constant 0 : index
    %95 = vector.load %arg14[%c0_53, %c0_54] : memref<512x128xbf16, #tpu.memory_space<vmem>>, vector<512x128xbf16>
    %cst_55 = arith.constant dense<0.000000e+00> : vector<1x128xf32>
    %96 = tpu.matmul %94, %95, %cst_55 {dimension_numbers = #tpu.dot_dimension_numbers<[1], [0], [0], [1], [0, 0, 1, 1], [], []>} : vector<1x512xbf16>, vector<512x128xbf16>, vector<1x128xf32> -> vector<1x128xf32>
    %c0_56 = arith.constant 0 : index
    %c0_57 = arith.constant 0 : index
    %97 = vector.load %arg15[%c0_56, %c0_57] : memref<2x128xf32, #tpu.memory_space<vmem>>, vector<1x128xf32>
    %98 = arith.addf %96, %97 : vector<1x128xf32>
    %cst_58 = arith.constant 0.000000e+00 : f32
    %99 = vector.broadcast %cst_58 : f32 to vector<1x128xf32>
    %100 = arith.maximumf %98, %99 : vector<1x128xf32>
    %c1_59 = arith.constant 1 : index
    %c0_60 = arith.constant 0 : index
    %101 = vector.load %arg15[%c1_59, %c0_60] : memref<2x128xf32, #tpu.memory_space<vmem>>, vector<1x128xf32>
    %102 = arith.addf %100, %101 : vector<1x128xf32>
    %103 = arith.truncf %102 : vector<1x128xf32> to vector<1x128xbf16>
    %c0_61 = arith.constant 0 : index
    %c0_62 = arith.constant 0 : index
    %104 = vector.load %arg16[%c0_61, %c0_62] : memref<128x128xbf16, #tpu.memory_space<vmem>>, vector<128x128xbf16>
    %cst_63 = arith.constant dense<0.000000e+00> : vector<1x128xf32>
    %105 = tpu.matmul %103, %104, %cst_63 {dimension_numbers = #tpu.dot_dimension_numbers<[1], [0], [0], [1], [0, 0, 1, 1], [], []>} : vector<1x128xbf16>, vector<128x128xbf16>, vector<1x128xf32> -> vector<1x128xf32>
    %c0_64 = arith.constant 0 : index
    %c0_65 = arith.constant 0 : index
    %106 = vector.load %arg17[%c0_64, %c0_65] : memref<1x128xf32, #tpu.memory_space<vmem>>, vector<1x128xf32>
    %107 = arith.addf %105, %106 : vector<1x128xf32>
    %c0_66 = arith.constant 0 : index
    %c0_67 = arith.constant 0 : index
    %c0_68 = arith.constant 0 : index
    %108 = vector.load %arg19[%c0_66, %c0_67, %c0_68] : memref<1x1x128xf32, #tpu.memory_space<vmem>>, vector<1x1x128xf32>
    %109 = vector.shape_cast %108 : vector<1x1x128xf32> to vector<1x128xf32>
    %110 = vector.shape_cast %102 : vector<1x128xf32> to vector<1x1x128xf32>
    tpu.vector_store %arg19[%c0_66, %c0_67, %c0_68], %110 {strides = array<i32>} : memref<1x1x128xf32, #tpu.memory_space<vmem>>, vector<1x1x128xf32>,
    %c0_69 = arith.constant 0 : index
    %c0_70 = arith.constant 0 : index
    %c0_71 = arith.constant 0 : index
    %111 = vector.load %arg18[%c0_69, %c0_70, %c0_71] : memref<1x1x128xf32, #tpu.memory_space<vmem>>, vector<1x1x128xf32>
    %112 = vector.shape_cast %111 : vector<1x1x128xf32> to vector<1x128xf32>
    %113 = vector.shape_cast %107 : vector<1x128xf32> to vector<1x1x128xf32>
    tpu.vector_store %arg18[%c0_69, %c0_70, %c0_71], %113 {strides = array<i32>} : memref<1x1x128xf32, #tpu.memory_space<vmem>>, vector<1x1x128xf32>,
    return
  }
  func.func @transform_0(%arg0: i32) -> (i32, i32, i32) {
    %c0_i32 = arith.constant 0 : i32
    %c0_i32_0 = arith.constant 0 : i32
    %c0_i32_1 = arith.constant 0 : i32
    return %arg0, %c0_i32, %c0_i32_0 : i32, i32, i32
  }
  func.func @transform_1(%arg0: i32) -> (i32, i32) {
    %c0_i32 = arith.constant 0 : i32
    %c0_i32_0 = arith.constant 0 : i32
    %c0_i32_1 = arith.constant 0 : i32
    return %c0_i32, %c0_i32_0 : i32, i32
  }
  func.func @transform_2(%arg0: i32) -> (i32, i32) {
    %c0_i32 = arith.constant 0 : i32
    %c0_i32_0 = arith.constant 0 : i32
    %c0_i32_1 = arith.constant 0 : i32
    return %c0_i32, %c0_i32_0 : i32, i32
  }
  func.func @transform_3(%arg0: i32) -> (i32, i32) {
    %c0_i32 = arith.constant 0 : i32
    %c0_i32_0 = arith.constant 0 : i32
    %c0_i32_1 = arith.constant 0 : i32
    return %c0_i32, %c0_i32_0 : i32, i32
  }
  func.func @transform_4(%arg0: i32) -> (i32, i32) {
    %c0_i32 = arith.constant 0 : i32
    %c0_i32_0 = arith.constant 0 : i32
    %c0_i32_1 = arith.constant 0 : i32
    return %c0_i32, %c0_i32_0 : i32, i32
  }
  func.func @transform_5(%arg0: i32) -> (i32, i32) {
    %c0_i32 = arith.constant 0 : i32
    %c0_i32_0 = arith.constant 0 : i32
    %c0_i32_1 = arith.constant 0 : i32
    return %c0_i32, %c0_i32_0 : i32, i32
  }
  func.func @transform_6(%arg0: i32) -> (i32, i32) {
    %c0_i32 = arith.constant 0 : i32
    %c0_i32_0 = arith.constant 0 : i32
    %c0_i32_1 = arith.constant 0 : i32
    return %c0_i32, %c0_i32_0 : i32, i32
  }
  func.func @transform_7(%arg0: i32) -> (i32, i32) {
    %c0_i32 = arith.constant 0 : i32
    %c0_i32_0 = arith.constant 0 : i32
    %c0_i32_1 = arith.constant 0 : i32
    return %c0_i32, %c0_i32_0 : i32, i32
  }
  func.func @transform_8(%arg0: i32) -> (i32, i32) {
    %c0_i32 = arith.constant 0 : i32
    %c0_i32_0 = arith.constant 0 : i32
    %c0_i32_1 = arith.constant 0 : i32
    return %c0_i32, %c0_i32_0 : i32, i32
  }
  func.func @transform_9(%arg0: i32) -> (i32, i32) {
    %c0_i32 = arith.constant 0 : i32
    %c0_i32_0 = arith.constant 0 : i32
    %c0_i32_1 = arith.constant 0 : i32
    return %c0_i32, %c0_i32_0 : i32, i32
  }
  func.func @transform_10(%arg0: i32) -> (i32, i32) {
    %c0_i32 = arith.constant 0 : i32
    %c0_i32_0 = arith.constant 0 : i32
    %c0_i32_1 = arith.constant 0 : i32
    return %c0_i32, %c0_i32_0 : i32, i32
  }
  func.func @transform_11(%arg0: i32) -> (i32, i32) {
    %c0_i32 = arith.constant 0 : i32
    %c0_i32_0 = arith.constant 0 : i32
    %c0_i32_1 = arith.constant 0 : i32
    return %c0_i32, %c0_i32_0 : i32, i32
  }
  func.func @transform_12(%arg0: i32) -> (i32, i32) {
    %c0_i32 = arith.constant 0 : i32
    %c0_i32_0 = arith.constant 0 : i32
    %c0_i32_1 = arith.constant 0 : i32
    return %c0_i32, %c0_i32_0 : i32, i32
  }
  func.func @transform_13(%arg0: i32) -> (i32, i32) {
    %c0_i32 = arith.constant 0 : i32
    %c0_i32_0 = arith.constant 0 : i32
    %c0_i32_1 = arith.constant 0 : i32
    return %c0_i32, %c0_i32_0 : i32, i32
  }
  func.func @transform_14(%arg0: i32) -> (i32, i32) {
    %c0_i32 = arith.constant 0 : i32
    %c0_i32_0 = arith.constant 0 : i32
    %c0_i32_1 = arith.constant 0 : i32
    return %c0_i32, %c0_i32_0 : i32, i32
  }
  func.func @transform_15(%arg0: i32) -> (i32, i32) {
    %c0_i32 = arith.constant 0 : i32
    %c0_i32_0 = arith.constant 0 : i32
    %c0_i32_1 = arith.constant 0 : i32
    return %c0_i32, %c0_i32_0 : i32, i32
  }
  func.func @transform_16(%arg0: i32) -> (i32, i32) {
    %c0_i32 = arith.constant 0 : i32
    %c0_i32_0 = arith.constant 0 : i32
    %c0_i32_1 = arith.constant 0 : i32
    return %c0_i32, %c0_i32_0 : i32, i32
  }
  func.func @transform_17(%arg0: i32) -> (i32, i32, i32) {
    %c0_i32 = arith.constant 0 : i32
    %c0_i32_0 = arith.constant 0 : i32
    %c0_i32_1 = arith.constant 0 : i32
    return %arg0, %c0_i32, %c0_i32_0 : i32, i32, i32
  }
  func.func @transform_18(%arg0: i32) -> (i32, i32, i32) {
    %c0_i32 = arith.constant 0 : i32
    %c0_i32_0 = arith.constant 0 : i32
    %c0_i32_1 = arith.constant 0 : i32
    return %arg0, %c0_i32, %c0_i32_0 : i32, i32, i32
  }
}

</mosaic_0001>

<bundles_post_ra>
// kernel: tdnn_v5_forward.1
= control target key start
LH: loop header
LB: loop body
LE: loop exit
PB: predicated region body
PF: predicated region fallthrough
CT: control target
= control target key end

     0   :  { %s5120_s0 = inlined_call_operand.vmem [shape: bf16[2,46,64], index: 0, kind: input, shape index: {}]   ;;  %s5121_s1 = inlined_call_operand.hbm [shape: bf16[320,128], index: 1, kind: input, shape index: {}]   ;;  %s5122_s2 = inlined_call_operand.vmem [shape: f32[2,128], index: 2, kind: input, shape index: {}]   ;;  %s5123_s3 = inlined_call_operand.hbm [shape: bf16[384,128], index: 3, kind: input, shape index: {}]   ;;  %s5124_s4 = inlined_call_operand.vmem [shape: f32[2,128], index: 4, kind: input, shape index: {}]   ;;  %s5125_s5 = inlined_call_operand.hbm [shape: bf16[384,128], index: 5, kind: input, shape index: {}]   ;;  %s5126_s6 = inlined_call_operand.vmem [shape: f32[2,128], index: 6, kind: input, shape index: {}]   ;;  %s5127_s7 = inlined_call_operand.hbm [shape: bf16[128,128], index: 7, kind: input, shape index: {}]   ;;  %s5128_s8 = inlined_call_operand.vmem [shape: f32[2,128], index: 8, kind: input, shape index: {}]   ;;  %s5129_s9 = inlined_call_operand.hbm [shape: bf16[128,128], index: 9, kind: input, shape index: {}]   ;;  %s5130_s10 = inlined_call_operand.vmem [shape: f32[2,128], index: 10, kind: input, shape index: {}]   ;;  %s5131_s11 = inlined_call_operand.hbm [shape: bf16[256,512], index: 11, kind: input, shape index: {}]   ;;  %s5132_s12 = inlined_call_operand.vmem [shape: f32[2,512], index: 12, kind: input, shape index: {}]   ;;  %s5133_s13 = inlined_call_operand.vmem [shape: bf16[512,128], index: 13, kind: input, shape index: {}]   ;;  %s5134_s14 = inlined_call_operand.vmem [shape: f32[2,128], index: 14, kind: input, shape index: {}]   ;;  %s5135_s15 = inlined_call_operand.hbm [shape: bf16[128,128], index: 15, kind: input, shape index: {}]   ;;  %s5136_s16 = inlined_call_operand.vmem [shape: f32[1,128], index: 16, kind: input, shape index: {}]   ;;  %s5137_s17 = inlined_call_operand.hbm [shape: f32[2,1,128], index: 17, kind: output, shape index: {0}]   ;;  %s5138_s18 = inlined_call_operand.hbm [shape: f32[2,1,128], index: 18, kind: output, shape index: {1}]  }
   0x1   :  { %5160 = sst [smem:[#allocation31_spill]] %s5120_s0 }
   0x2   :  { %5161 = sst [smem:[#allocation32_spill]] %s5121_s1 }
   0x3   :  { %5162 = sst [smem:[#allocation33_spill]] %s5122_s2 }
   0x4   :  { %5163 = sst [smem:[#allocation34_spill]] %s5123_s3 }
   0x5   :  { %5164 = sst [smem:[#allocation35_spill]] %s5127_s7 }
   0x6   :  { %5165 = sst [smem:[#allocation36_spill]] %s5134_s14 }
   0x7   :  { %5166 = sst [smem:[#allocation37_spill]] %s5136_s16 }
   0x8   :  { %5167 = sst [smem:[#allocation38_spill]] %s5137_s17 }
   0x9   :  { %5168 = sst [smem:[#allocation39_spill]] %s5138_s18 }
   0xa   :  { %24 = vsyncpa [#allocation3], 0 }
   0xb   :  { %25 = vsyncpa [#allocation6], 0 }
   0xc   :  { %26 = vsyncpa [#allocation9], 0 }
   0xd   :  { %27 = vsyncpa [#allocation12], 0 }
   0xe   :  { %28 = vsyncpa [#allocation4], 0 }
   0xf   :  { %30 = vsyncpa [#allocation4 + $0x1], 0 }
  0x10   :  { %31 = vsyncpa [#allocation16], 0 }
  0x11   :  { %33 = vsyncpa [#allocation16 + $0x1], 0  ;;  %s4565_s27 = smov 0   ;;  %s4567_s28 = smov 0  }
  0x12   :  { %s4569_s29 = smov 0   ;;  %s4571_s30 = smov 0  }
  0x13 LB: > { %5169 = sst [smem:[#allocation23_spill]] %s4440_s27  ;;  %s4586_s0 = sadd.s32 4294967295, %s4452_s30   ;;  %s4452_s30 = sphi %s4571_s30, %s5211_s30   ;;  %s4448_s29 = sphi %s4569_s29, %s5214_s29   ;;  %s4444_s28 = sphi %s4567_s28, %s5213_s28   ;;  %s4440_s27 = sphi %s4565_s27, %s5212_s27  }
  0x14   : > { %5170 = sst [smem:[#allocation24_spill]] %s4444_s28  ;;  %s3245_s19 = sadd.s32 4294967294, %s4452_s30  }
  0x15   : > { %5171 = sst [smem:[#allocation25_spill]] %s4448_s29  ;;  %s4590_s1 = sadd.s32 1, %s4452_s30  }
  0x16   : > { %5172 = sst [smem:[#allocation26_spill]] %s4452_s30  ;;  %s408_s20 = sadd.s32 1, %s4448_s29 }
  0x17   : > { %5173 = sst [smem:[#allocation27_spill]] %s4590_s1  ;;  %s405_s21 = ssub.s32 %s4452_s30, %s4590_s1 }
  0x18   : > { %p418_p0 = scmp.ne.s32.totalorder %s4448_s29, %s4444_s28  ;;  %p406_p1 = scmp.eq.s32.totalorder %s405_s21, 0 }
  0x19   : > { %p419_p2 = scmp.eq.s32.totalorder %s4586_s0, 1  ;;  %p424_p3 = scmp.ne.s32.totalorder %s4444_s28, %s4440_s27 }
  0x1a   : > { %p425_p4 = scmp.eq.s32.totalorder %s3245_s19, 1  ;;  %p3246_p7 = scmp.ge.s32.totalorder %s4452_s30, 1 }
  0x1b   : > { %s4601_s22 = scalar_select %p406_p1, %s4448_s29, %s408_s20  }
  0x1c   : > { %p4603_p5 = por %p419_p2, %p418_p0  ;;  %p4607_p6 = por %p425_p4, %p424_p3 }
  0x1d   : > { %5174 = sst [smem:[#allocation28_spill]] %s4601_s22  ;;  %p458_p8 = scmp.lt.s32.totalorder %s4452_s30, 3 }
  0x1e   : > { %s5175_s2 = scalar_select %p4603_p5, 1, 0 }
  0x1f   : > { %s5177_s23 = scalar_select %p4607_p6, 1, 0 }
  0x20   : > { %5176 = sst [smem:[#allocation29_spill]] %s5175_s2  ;;  %p5148_p9 = scmp.eq.s32.totalorder %s4586_s0, 0 }
  0x21   : > { %5178 = sst [smem:[#allocation30_spill]] %s5177_s23  ;;  %p4614_p10 = pnand %p3246_p7, %p458_p8 }
  0x22   : > { %s4454_s25 = smov [#allocation5]   ;;  %s4455_s20 = smov [#allocation8]  }
  0x23   : > { %s5179_s24 = scalar_select %p4614_p10, 1, 0 }
  0x24   : > { %p3831_p11 = pneg %p4614_p10  ;;  %s486_s26 = sshll.u32 %s4454_s25, 4  ;;  %s4620_s26 = int_to_ptr.vmem [resolvable:$true] %s486_s26 }
  0x25   : > { %s518_s21 = sshll.u32 %s4455_s20, 4  ;;  %s4456_s22 = smov [#allocation11]   ;;  %s4628_s21 = int_to_ptr.vmem [resolvable:$true] %s518_s21 }
  0x26   : > { %p4624_p12 = pnand %p5148_p9, %p3831_p11  ;;  %s4630_s29 = sshll.u32 %s4456_s22, 4  ;;  %s551_s29 = int_to_ptr.vmem [resolvable:$true] %s4630_s29 }
  0x27   : > { %s5181_s3 = sld [smem:[#allocation34_spill]] }
  0x28   : > { %p4640_p0 = pneg %p4624_p12 }
  0x2d   : > { %s4146_s27 = scalar_lea.hbm %s5181_s3, 3072 }
  0x2e   : > { %p4147_p13 = scmp.ne.s32.totalorder %s5181_s3, %s4146_s27  ;;  %p4153_p3 = scmp.lt.u32.totalorder %s4146_s27, %s5181_s3 }
  0x30   : > { %p4149_p1 = pnand %p4640_p0, %p4147_p13 }
  0x32   : > { %p4150_p2 = pneg %p4149_p1 }
  0x34   : > { %p4155_p4 = pnand %p4153_p3, %p4150_p2 }
  0x36   : > { %4158 = shalt.err (!%p4155_p4)
}
  0x37   : > { %s4159_s30 = scalar_lea.vmem %s4620_s26, 3072  ;;  %p4167_p9 = scmp.lt.s32.totalorder %s4620_s26, %s4620_s26 }
  0x38   : > { %p4160_p7 = scmp.ne.s32.totalorder %s4620_s26, %s4159_s30  ;;  %p4168_p6 = scmp.lt.s32.totalorder %s4159_s30, %s4159_s30 }
  0x3a   : > { %p4162_p8 = pnand %p4160_p7, %p4640_p0  ;;  %p4169_p13 = por %p4168_p6, %p4167_p9 }
  0x3c   : > { %p4163_p11 = pneg %p4162_p8 }
  0x3e   : > { %p4170_p1 = pnand %p4169_p13, %p4163_p11 }
  0x40   : > { %4173 = shalt.err (!%p4170_p1)
}
  0x41   : > { %s5155_s1 = smov 64   ;;  %s5157_s27 = smov 4  }
  0x42   : > { %3837 = dma.hbm_to_vmem [thread:$0]  (!%p4624_p12), %s5181_s3, 3072, %s4620_s26, [#allocation6], %s5155_s1, %s5155_s1, %s5157_s27  }
  0x43   : > { %s5183_s7 = sld [smem:[#allocation35_spill]] }
  0x49   : > { %s4174_s30 = scalar_lea.hbm %s5183_s7, 1024 }
  0x4a   : > { %p4175_p6 = scmp.ne.s32.totalorder %s5183_s7, %s4174_s30  ;;  %p4181_p3 = scmp.lt.u32.totalorder %s4174_s30, %s5183_s7 }
  0x4c   : > { %p4177_p9 = pnand %p4175_p6, %p4640_p0 }
  0x4e   : > { %p4178_p2 = pneg %p4177_p9 }
  0x50   : > { %p4183_p4 = pnand %p4181_p3, %p4178_p2 }
  0x52   : > { %4186 = shalt.err (!%p4183_p4)
}
  0x53   : > { %s4187_s26 = scalar_lea.vmem %s4628_s21, 1024  ;;  %p4195_p13 = scmp.lt.s32.totalorder %s4628_s21, %s4628_s21 }
  0x54   : > { %p4188_p7 = scmp.ne.s32.totalorder %s4628_s21, %s4187_s26  ;;  %p4196_p1 = scmp.lt.s32.totalorder %s4187_s26, %s4187_s26 }
  0x56   : > { %p4190_p8 = pnand %p4188_p7, %p4640_p0  ;;  %p4197_p6 = por %p4196_p1, %p4195_p13 }
  0x58   : > { %p4191_p11 = pneg %p4190_p8 }
  0x5a   : > { %p4198_p9 = pnand %p4197_p6, %p4191_p11 }
  0x5c   : > { %4201 = shalt.err (!%p4198_p9)
}
  0x5d   : > { %3843 = dma.hbm_to_vmem [thread:$0]  (!%p4624_p12), %s5183_s7, 1024, %s4628_s21, [#allocation9], %s5155_s1, %s5155_s1, %s5157_s27  }
  0x5e   : > { %s4202_s23 = scalar_lea.hbm %s5131_s11, 8192 }
  0x5f   : > { %p4203_p2 = scmp.ne.s32.totalorder %s5131_s11, %s4202_s23  ;;  %p4209_p7 = scmp.lt.u32.totalorder %s4202_s23, %s5131_s11 }
  0x61   : > { %p4205_p3 = pnand %p4203_p2, %p4640_p0 }
  0x63   : > { %p4206_p4 = pneg %p4205_p3 }
  0x65   : > { %p4211_p8 = pnand %p4209_p7, %p4206_p4 }
  0x67   : > { %4214 = shalt.err (!%p4211_p8)
}
  0x68   : > { %s4215_s26 = scalar_lea.vmem %s551_s29, 8192  ;;  %p4223_p6 = scmp.lt.s32.totalorder %s551_s29, %s551_s29 }
  0x69   : > { %p4216_p11 = scmp.ne.s32.totalorder %s551_s29, %s4215_s26  ;;  %p4224_p9 = scmp.lt.s32.totalorder %s4215_s26, %s4215_s26 }
  0x6b   : > { %p4218_p13 = pnand %p4216_p11, %p4640_p0  ;;  %p4225_p5 = por %p4224_p9, %p4223_p6 }
  0x6d   : > { %p4219_p1 = pneg %p4218_p13 }
  0x6f   : > { %p4226_p10 = pnand %p4225_p5, %p4219_p1 }
  0x71   : > { %4229 = shalt.err (!%p4226_p10)
}
  0x72   : > { %s4459_s21 = smov 256   ;;  %s4460_s14 = smov 16  }
  0x73   : > { %3849 = dma.hbm_to_vmem [thread:$0]  (!%p4624_p12), %s5131_s11, 8192, %s551_s29, [#allocation12], %s4459_s21, %s4459_s21, %s4460_s14  }
  0x74   : > { %s4461_s2 = smov [#allocation2]   ;;  %s4462_s25 = smov [#allocation7]  }
  0x75   : > { %s470_s23 = sshll.u32 %s4461_s2, 4  ;;  %s502_s20 = sshll.u32 %s4462_s25, 4  ;;  %s471_s23 = int_to_ptr.vmem [resolvable:$true] %s470_s23  ;;  %s503_s20 = int_to_ptr.vmem [resolvable:$true] %s502_s20 }
  0x76   : > { %s5184_s26 = sld [smem:[#allocation32_spill]] }
  0x7c   : > { %s4230_s1 = scalar_lea.hbm %s5184_s26, 2560 }
  0x7d   : > { %p4231_p5 = scmp.ne.s32.totalorder %s5184_s26, %s4230_s1  ;;  %p4237_p3 = scmp.lt.u32.totalorder %s4230_s1, %s5184_s26 }
  0x7f   : > { %p4233_p10 = pnand %p4231_p5, %p4640_p0 }
  0x81   : > { %p4234_p2 = pneg %p4233_p10 }
  0x83   : > { %p4239_p4 = pnand %p4237_p3, %p4234_p2 }
  0x85   : > { %4242 = shalt.err (!%p4239_p4)
}
  0x86   : > { %s4243_s29 = scalar_lea.vmem %s471_s23, 2560  ;;  %p4251_p13 = scmp.lt.s32.totalorder %s471_s23, %s471_s23 }
  0x87   : > { %p4244_p7 = scmp.ne.s32.totalorder %s471_s23, %s4243_s29  ;;  %p4252_p1 = scmp.lt.s32.totalorder %s4243_s29, %s4243_s29 }
  0x89   : > { %p4246_p8 = pnand %p4244_p7, %p4640_p0  ;;  %p4253_p6 = por %p4252_p1, %p4251_p13 }
  0x8b   : > { %p4247_p11 = pneg %p4246_p8 }
  0x8d   : > { %p4254_p9 = pnand %p4253_p6, %p4247_p11 }
  0x8f   : > { %4257 = shalt.err (!%p4254_p9)
}
  0x90   : > { %s5185_s3 = smov 4   ;;  %s5186_s27 = smov 64  }
  0x91   : > { %3834 = dma.hbm_to_vmem [thread:$0]  (!%p4624_p12), %s5184_s26, 2560, %s471_s23, [#allocation3], %s5186_s27, %s5186_s27, %s5185_s3  }
  0x92   : > { %s4258_s14 = scalar_lea.hbm %s5125_s5, 3072 }
  0x93   : > { %p4259_p5 = scmp.ne.s32.totalorder %s5125_s5, %s4258_s14  ;;  %p4265_p3 = scmp.lt.u32.totalorder %s4258_s14, %s5125_s5 }
  0x95   : > { %p4261_p10 = pnand %p4259_p5, %p4640_p0 }
  0x97   : > { %p4262_p2 = pneg %p4261_p10 }
  0x99   : > { %p4267_p4 = pnand %p4265_p3, %p4262_p2 }
  0x9b   : > { %4270 = shalt.err (!%p4267_p4)
}
  0x9c   : > { %s4271_s22 = scalar_lea.vmem %s503_s20, 3072  ;;  %p4279_p13 = scmp.lt.s32.totalorder %s503_s20, %s503_s20 }
  0x9d   : > { %p4272_p7 = scmp.ne.s32.totalorder %s503_s20, %s4271_s22  ;;  %p4280_p1 = scmp.lt.s32.totalorder %s4271_s22, %s4271_s22 }
  0x9f   : > { %p4274_p8 = pnand %p4272_p7, %p4640_p0  ;;  %p4281_p6 = por %p4280_p1, %p4279_p13 }
  0xa1   : > { %p4275_p11 = pneg %p4274_p8 }
  0xa3   : > { %p4282_p9 = pnand %p4281_p6, %p4275_p11 }
  0xa5   : > { %4285 = shalt.err (!%p4282_p9)
}
  0xa6   : > { %3840 = dma.hbm_to_vmem [thread:$0]  (!%p4624_p12), %s5125_s5, 3072, %s503_s20, [#allocation6], %s5186_s27, %s5186_s27, %s5185_s3  }
  0xa7   : > { %s4463_s29 = smov [#allocation10]   ;;  %s4464_s28 = smov [#allocation13]  }
  0xa8   : > { %s534_s7 = sshll.u32 %s4463_s29, 4  ;;  %s572_s1 = sshll.u32 %s4464_s28, 4  ;;  %s535_s7 = int_to_ptr.vmem [resolvable:$true] %s534_s7  ;;  %s573_s1 = int_to_ptr.vmem [resolvable:$true] %s572_s1 }
  0xa9   : > { %s4286_s16 = scalar_lea.hbm %s5129_s9, 1024 }
  0xaa   : > { %p4287_p5 = scmp.ne.s32.totalorder %s5129_s9, %s4286_s16  ;;  %p4293_p3 = scmp.lt.u32.totalorder %s4286_s16, %s5129_s9 }
  0xac   : > { %p4289_p10 = pnand %p4287_p5, %p4640_p0 }
  0xae   : > { %p4290_p2 = pneg %p4289_p10 }
  0xb0   : > { %p4295_p4 = pnand %p4293_p3, %p4290_p2 }
  0xb2   : > { %4298 = shalt.err (!%p4295_p4)
}
  0xb3   : > { %s4299_s20 = scalar_lea.vmem %s535_s7, 1024  ;;  %p4307_p13 = scmp.lt.s32.totalorder %s535_s7, %s535_s7 }
  0xb4   : > { %p4300_p7 = scmp.ne.s32.totalorder %s535_s7, %s4299_s20  ;;  %p4308_p1 = scmp.lt.s32.totalorder %s4299_s20, %s4299_s20 }
  0xb6   : > { %p4302_p8 = pnand %p4300_p7, %p4640_p0  ;;  %p4309_p6 = por %p4308_p1, %p4307_p13 }
  0xb8   : > { %p4303_p11 = pneg %p4302_p8 }
  0xba   : > { %p4310_p9 = pnand %p4309_p6, %p4303_p11 }
  0xbc   : > { %4313 = shalt.err (!%p4310_p9)
}
  0xbd   : > { %3846 = dma.hbm_to_vmem [thread:$0]  (!%p4624_p12), %s5129_s9, 1024, %s535_s7, [#allocation9], %s5186_s27, %s5186_s27, %s5185_s3  }
  0xbe   : > { %s4314_s21 = scalar_lea.hbm %s5135_s15, 1024 }
  0xbf   : > { %p4315_p5 = scmp.ne.s32.totalorder %s5135_s15, %s4314_s21  ;;  %p4321_p3 = scmp.lt.u32.totalorder %s4314_s21, %s5135_s15 }
  0xc1   : > { %p4317_p10 = pnand %p4315_p5, %p4640_p0 }
  0xc3   : > { %p4318_p2 = pneg %p4317_p10 }
  0xc5   : > { %p4323_p4 = pnand %p4321_p3, %p4318_p2 }
  0xc7   : > { %4326 = shalt.err (!%p4323_p4)
}
  0xc8   : > { %s4327_s25 = scalar_lea.vmem %s573_s1, 1024  ;;  %p4335_p13 = scmp.lt.s32.totalorder %s573_s1, %s573_s1 }
  0xc9   : > { %p4328_p7 = scmp.ne.s32.totalorder %s573_s1, %s4327_s25  ;;  %p4336_p1 = scmp.lt.s32.totalorder %s4327_s25, %s4327_s25 }
  0xcb   : > { %p4330_p8 = pnand %p4328_p7, %p4640_p0  ;;  %p4337_p6 = por %p4336_p1, %p4335_p13 }
  0xcd   : > { %p4331_p11 = pneg %p4330_p8 }
  0xcf   : > { %p4338_p9 = pnand %p4337_p6, %p4331_p11 }
  0xd1   : > { %4341 = shalt.err (!%p4338_p9)
}
  0xd2   : > { %3852 = dma.hbm_to_vmem [thread:$0]  (!%p4624_p12), %s5135_s15, 1024, %s573_s1, [#allocation12], %s5186_s27, %s5186_s27, %s5185_s3  }
  0xd3   : > { %p5187_p5 = scmp.ne.s32.totalorder %s5179_s24, 0 }
  0xd4   : > { %p5188_p0 = scmp.eq.s32.totalorder (!%p5187_p5), %s4586_s0, 0 }
  0xd5   : > { %599 = sbr.rel (%p5187_p5) target bundleno = 2248 (0x8c8), region = 88 }
  0xdc   : > { %4415 = dma.done.wait (%p5188_p0), [#allocation3], 2560   ;;  %p5189_p10 = pmov %p5188_p0 }
  0xdd   : > { %p5190_p2 = pmov %p5188_p0 }
  0xde   : > { %4417 = vsyncadd (%p5189_p10), [#allocation3], 4294964736 }
  0xdf   : > { %4419 = dma.done.wait (%p5190_p2), [#allocation6], 6144   ;;  %p5191_p3 = pmov %p5188_p0 }
  0xe0   : > { %p5192_p4 = pmov %p5188_p0 }
  0xe1   : > { %4421 = vsyncadd (%p5191_p3), [#allocation6], 4294961152 }
  0xe2   : > { %4423 = dma.done.wait (%p5192_p4), [#allocation9], 2048   ;;  %p5193_p12 = pmov %p5188_p0 }
  0xe3   : > { %p5194_p7 = pmov %p5188_p0 }
  0xe4   : > { %4425 = vsyncadd (%p5193_p12), [#allocation9], 4294965248 }
  0xe5   : > { %4427 = dma.done.wait (%p5194_p7), [#allocation12], 9216   ;;  %p5195_p8 = pmov %p5188_p0 }
  0xe6   : > { %p680_p11 = scmp.lt.s32.totalorder %s4586_s0, 1  ;;  %v4465_v0 = vmov 0.0   ;;  %s5196_s27 = sld [smem:[#allocation31_spill]]  ;;  %vm743_vm0 = vsmask.f32 6400  ;;  %v3924_v10 = vld [vmem:[#allocation2 + $0x40] sm:$0xff]  }
  0xe7   : > { %4429 = vsyncadd (%p5195_p8), [#allocation12], 4294958080  ;;  %3670 = vmatprep.subr.bf16.mxu1 %v4465_v0  ;;  %vm707_vm1 = vsmask.f32 7424  ;;  %v3925_v11 = vld [vmem:[#allocation2] sm:$0xff]   ;;  %3473 = vmatprep.subr.bf16.mxu0 %v3924_v10  ;;  %v3926_v22 = vld [vmem:[#allocation2 + $0x48] sm:$0xff]  }
  0xe8   : > { %s681_s17 = scalar_select %p680_p11, %s4586_s0, 1  ;;  %3474 = vmatpush3.bf16.msra.mxu0 %v3925_v11  ;;  %v3927_v27 = vld [vmem:[#allocation2 + $0x8] sm:$0xff]   ;;  %v3928_v29 = vld [vmem:[#allocation2 + $0x50] sm:$0xff]   ;;  %v3930_v34 = vld [vmem:[#allocation2 + $0x58] sm:$0xff]   ;;  %vm4467_vm2 = vmmov 0   ;;  %vm767_vm3 = vcmask 523264  }
  0xe9   : > { %3475 = vmatprep.subr.bf16.mxu0 %v3926_v22  ;;  %s4466_s20 = smov 64   ;;  %v3929_v32 = vld [vmem:[#allocation2 + $0x10] sm:$0xff]   ;;  %3678 = vmatprep.mubr.msk.bf16.mxu1 %vm4467_vm2, %v4465_v0  ;;  %v3931_v35 = vld [vmem:[#allocation2 + $0x18] sm:$0xff]   ;;  %v3934_v37 = vld [vmem:[#allocation2 + $0x80] sm:$0xff]   ;;  %vm761_vm4 = vcmask 1045504   ;;  %vm737_vm5 = vcmask 1046528  }
  0xea   : > { %s3798_s24 = smul.u32 24, %s681_s17  ;;  %v3932_v38 = vld [vmem:[#allocation2 + $0x60] sm:$0xff]   ;;  %3671 = vmatpush3.bf16.msra.mxu1 %v3934_v37  ;;  %v3937_v39 = vld [vmem:[#allocation2 + $0x88] sm:$0xff]   ;;  %v3940_v42 = vld [vmem:[#allocation2 + $0x90] sm:$0xff]   ;;  %s5197_s29 = sld [smem:[#allocation33_spill]]  ;;  %vm1474_vm6 = vcmask 1044480  }
  0xeb   : > { %3672 = vmatprep.subr.bf16.mxu1 %v4465_v0  ;;  %v3933_v40 = vld [vmem:[#allocation2 + $0x20] sm:$0xff]   ;;  %v3935_v41 = vld [vmem:[#allocation2 + $0x68] sm:$0xff]   ;;  %v3938_v44 = vld [vmem:[#allocation2 + $0x70] sm:$0xff]   ;;  %s5202_s28 = sld [smem:[#allocation29_spill]]  ;;  %s3469_s7 = sshll.u32 %s4586_s0, 4 }
  0xec   : > { %s684_s1 = scalar_lea.vmem %s5196_s27, %s3798_s24  ;;  %3476 = vmatpush3.bf16.msra.mxu0 %v3927_v27  ;;  %v3936_v43 = vld [vmem:[#allocation2 + $0x28] sm:$0xff]   ;;  %v3939_v46 = vld [vmem:[#allocation2 + $0x30] sm:$0xff]   ;;  %v3943_v47 = vld [vmem:[#allocation2 + $0x98] sm:$0xff]   ;;  %s5203_s24 = sld [smem:[#allocation39_spill]] }
  0xed   : > { %v4817_v1 = vld [vmem:[%s684_s1] sm:$0xff]   ;;  %v4819_v2 = vld [vmem:[%s684_s1 + $0x8] sm:$0xff]   ;;  %v4821_v3 = vld [vmem:[%s684_s1 + $0x10] sm:$0x7f]   ;;  %3477 = vmatprep.subr.bf16.mxu0 %v3928_v29 }
  0xee   : > { %v709_v4 = vshrl.u32 %v4817_v1, 16  ;;  %v711_v5 = vshll.u32 %v4817_v1, 16  ;;  %v716_v6 = vshll.u32 %v4819_v2, 16  ;;  %v720_v7 = vshrl.u32 %v4819_v2, 16  ;;  %3673 = vmatpush3.bf16.msra.mxu1 %v3937_v39  ;;  %v3941_v49 = vld [vmem:[#allocation2 + $0x78] sm:$0xff]   ;;  %v3944_v50 = vld [vmem:[#allocation5 + $0x40] sm:$0xff]  }
  0xef   : > { %v724_v8 = vshll.u32 %v4821_v3, 16  ;;  %v728_v9 = vshrl.u32 %v4821_v3, 16  ;;  %3674 = vmatprep.subr.bf16.mxu1 %v4465_v0  ;;  %v762_v45 = vrot.slane %v4817_v1, 2  ;;  %v763_v48 = vrot.slane %v4819_v2, 2  ;;  %v3946_v52 = vld [vmem:[#allocation5] sm:$0xff]   ;;  %v3942_v53 = vld [vmem:[#allocation2 + $0x38] sm:$0xff]  }
  0xf0   : > { %v744_v12 = vrot.slane %v709_v4, 1  ;;  %v745_v13 = vrot.slane %v711_v5, 2  ;;  %v747_v14 = vrot.slane %v720_v7, 1  ;;  %v748_v15 = vrot.slane %v716_v6, 2  ;;  %3478 = vmatpush3.bf16.msra.mxu0 %v3929_v32  ;;  %v3958_v22 = vld [vmem:[#allocation5 + $0x20] sm:$0xff]   ;;  %v3963_v27 = vld [vmem:[#allocation5 + $0xb0] sm:$0xff]   ;;  %s5198_s21 = smov %s5197_s29 }
  0xf1   : > { %v713_v16 = vrot.slane %v711_v5, 1  ;;  %v718_v17 = vrot.slane %v716_v6, 1  ;;  %v751_v18 = vrot.slane %v728_v9, 1  ;;  %v752_v19 = vrot.slane %v724_v8, 2  ;;  %3479 = vmatprep.subr.bf16.mxu0 %v3930_v34  ;;  %v3965_v29 = vld [vmem:[#allocation5 + $0x78] sm:$0xff]   ;;  %p5204_p1 = scmp.ne.s32.totalorder %s5202_s28, 0 }
  0xf2   : > { %v746_v20 = vor.u32 %v745_v13, %v744_v12  ;;  %v749_v21 = vor.u32 %v748_v15, %v747_v14  ;;  %v726_v26 = vrot.slane %v724_v8, 1  ;;  %3675 = vmatpush3.bf16.msra.mxu1 %v3940_v42  ;;  %v765_v51 = vrot.slane %v4821_v3, 2  ;;  %v3948_v14 = vld [vmem:[#allocation5 + $0x88] sm:$0xff]   ;;  %s5048_s19 = scalar_lea.hbm %s5203_s24, %s3469_s7 }
  0xf3   : > { %v714_v23 = vor.u32 %v713_v16, %v709_v4  ;;  %v753_v24 = vor.u32 %v752_v19, %v751_v18  ;;  %v722_v25 = vor.u32 %v720_v7, %v718_v17  ;;  %3676 = vmatprep.subr.bf16.mxu1 %v4465_v0  ;;  %v764_v54 = vsel %vm761_vm4, %v762_v45, %v763_v48  ;;  %v3945_v4 = vld [vmem:[#allocation5 + $0x80] sm:$0xff]   ;;  %v3949_v15 = vld [vmem:[#allocation5 + $0x8] sm:$0xff]   ;;  %v3951_v16 = vld [vmem:[#allocation5 + $0x90] sm:$0xff]  }
  0xf4   : > { %v750_v28 = vsel %vm743_vm0, %v746_v20, %v749_v21  ;;  %v730_v36 = vor.u32 %v728_v9, %v726_v26  ;;  %3480 = vmatpush3.bf16.msra.mxu0 %v3931_v35  ;;  %v766_v55 = vsel %vm761_vm4, %v763_v48, %v765_v51  ;;  %v738_v56 = vrot.slane %v4817_v1, 1  ;;  %v3954_v18 = vld [vmem:[#allocation5 + $0x98] sm:$0xff]   ;;  %v3956_v20 = vld [vmem:[#allocation5 + $0x60] sm:$0xff]  }
  0xf5   : > { %755 = vrot.lane.b32.xlu0 %v750_v28, %s4466_s20  ;;  %v754_v30 = vsel %vm743_vm0, %v749_v21, %v753_v24  ;;  %v719_v31 = vsel %vm707_vm1, %v714_v23, %v718_v17  ;;  %v727_v33 = vsel %vm707_vm1, %v722_v25, %v726_v26  ;;  %3481 = vmatprep.subr.bf16.mxu0 %v3932_v38  ;;  %v739_v57 = vrot.slane %v4819_v2, 1  ;;  %v3952_v17 = vld [vmem:[#allocation5 + $0x10] sm:$0xff]   ;;  %v3955_v19 = vld [vmem:[#allocation5 + $0x18] sm:$0xff]   ;;  %v3957_v21 = vld [vmem:[#allocation5 + $0xa0] sm:$0xff]  }
  0xf6   : > { %757 = vrot.lane.b32.xlu1 %v754_v30, %s4466_s20  ;;  %3677 = vmatpush3.bf16.msra.mxu1 %v3943_v47  ;;  %v741_v58 = vrot.slane %v4821_v3, 1  ;;  %v3959_v23 = vld [vmem:[#allocation5 + $0x68] sm:$0xff]   ;;  %v3962_v26 = vld [vmem:[#allocation5 + $0x70] sm:$0xff]   ;;  %v3966_v30 = vld [vmem:[#allocation5 + $0xb8] sm:$0xff]  }
  0xf7   : > { %3514 = vmatprep.subr.bf16.mxu1 %v3944_v50  ;;  %v740_v59 = vsel %vm737_vm5, %v738_v56, %v739_v57  ;;  %v3961_v25 = vld [vmem:[#allocation5 + $0x28] sm:$0xff]   ;;  %v3964_v28 = vld [vmem:[#allocation5 + $0x30] sm:$0xff]  }
  0xf8   : > { %3482 = vmatpush3.bf16.msra.mxu0 %v3933_v40  ;;  %v742_v63 = vsel %vm737_vm5, %v739_v57, %v741_v58  ;;  %v3291_v57 = vld [vmem:[%s5198_s21 + $0x1] ss:$0 sm:$0xff] }
  0xf9   : > { %731 = vrot.lane.b32.xlu0 %v719_v31, %s4466_s20  ;;  %3483 = vmatprep.subr.bf16.mxu0 %v3935_v41  ;;  %v3967_v31 = vld [vmem:[#allocation5 + $0x38] sm:$0xff]  }
  0xfa   : > { %733 = vrot.lane.b32.xlu1 %v727_v33, %s4466_s20  ;;  %3679 = vmatmul.mubr.msk.bf16.vlgmr.msra.gmra.mrb[0].mxu1 %vm767_vm3, %v764_v54 }
  0xfb   : > { %3682 = vmatprep.mubr.msk.bf16.mxu1 %vm4467_vm2, %v4465_v0  ;;  %3515 = vmatpush3.bf16.msra.mxu1 %v3946_v52 }
  0xfc   : > { %3484 = vmatpush3.bf16.msra.mxu0 %v3936_v43 }
  0xfd   : > { %759 = vrot.lane.b32.xlu0 %v753_v24, %s4466_s20  ;;  %3485 = vmatprep.subr.bf16.mxu0 %v3938_v44  ;;  %v3960_v24 = vld [vmem:[#allocation5 + $0xa8] sm:$0xff]  }
  0xfe   : > { %735 = vrot.lane.b32.xlu1 %v730_v36, %s4466_s20  ;;  %s5199_s20 = sld [smem:[#allocation24_spill]] }
 0x100   : > { %3486 = vmatpush3.bf16.msra.mxu0 %v3939_v46  ;;  %v3267_v46 = vld [vmem:[%s5197_s29] ss:$0 sm:$0xff]  ;;  %s5200_s29 = sld [smem:[#allocation36_spill]] }
 0x101   : > { %3487 = vmatprep.subr.bf16.mxu0 %v3941_v49 }
 0x102   : > { %3683 = vmatmul.mubr.msk.bf16.gmra.mrb[4].mxu1 %vm767_vm3, %v766_v55 }
 0x103   : > { %3686 = vmatprep.mubr.msk.bf16.mxu1 %vm4467_vm2, %v4465_v0 }
 0x104   : > { %3488 = vmatpush3.bf16.msra.mxu0 %v3942_v53  ;;  %s5036_s16 = sand.u32 1, %s5199_s20   ;;  %s4468_s20 = smov [#allocation15]  }
 0x105   : > { %3690 = vmatprep.subr.bf16.mxu0 %v4465_v0  ;;  %s679_s25 = scalar_lea.vmem [#allocation15], %s5036_s16  ;;  %s3068_s27 = scalar_lea.sflag [#allocation16], %s5036_s16 }
 0x106   : > { %s5201_s14 = smov %s5200_s29  ;;  %s3093_s3 = sshll.u32 %s679_s25, 4  ;;  %s3094_s3 = int_to_ptr.vmem [resolvable:$true] %s3093_s3 }
 0x107   : > { %s4342_s1 = scalar_lea.vmem %s3094_s3, 16  ;;  %s4346_s23 = sshll.u32 %s4468_s20, 4  ;;  %s4347_s23 = int_to_ptr.vmem [resolvable:$false] %s4346_s23 }
 0x108   : > { %p4343_p13 = scmp.ne.s32.totalorder %s3094_s3, %s4342_s1  ;;  %s4348_s30 = scalar_lea.vmem %s4347_s23, 32 }
 0x109   : > { %p4349_p5 = scmp.lt.s32.totalorder %s3094_s3, %s4347_s23  ;;  %p4350_p0 = scmp.lt.s32.totalorder %s4348_s30, %s4342_s1 }
 0x10a   : > { %3687 = vmatmul.mubr.msk.bf16.gmra.mrb[8].mxu1 %vm767_vm3, %v765_v51  ;;  %p4344_p6 = pnand %p4343_p13, %p5204_p1 }
 0x10b   : > { %p4351_p10 = por %p4350_p0, %p4349_p5 }
 0x10c   : > { %p4345_p9 = pneg %p4344_p6 }
 0x10e   : > { %p4352_p2 = pnand %p4351_p10, %p4345_p9 }
 0x167   : > { %v756_v60 = vpop.permute.xlu0 %755 }
 0x168   : > { %v779_v61 = vsel %vm767_vm3, %v740_v59, %v756_v60  ;;  %v758_v62 = vpop.permute.xlu1 %757 }
 0x169   : > { %995 = vmatprep.mubr.bf16.mxu0 %v779_v61  ;;  %v783_v6 = vsel %vm767_vm3, %v742_v63, %v758_v62 }
 0x16b   : > { %v732_v5 = vpop.permute.xlu0 %731 }
 0x16c   : > { %v769_v7 = vsel %vm767_vm3, %v4817_v1, %v732_v5  ;;  %v734_v8 = vpop.permute.xlu1 %733  ;;  %v3947_v1 = vld [vmem:[#allocation5 + $0x48] sm:$0xff]  }
 0x16d   : > { %996 = vmatmul.mubr.bf16.vlgmr.msra.gmra.mrb[0].mxu0 %v769_v7  ;;  %v772_v10 = vsel %vm767_vm3, %v4819_v2, %v734_v8  ;;  %3516 = vmatprep.subr.bf16.mxu1 %v3947_v1  ;;  %v3950_v2 = vld [vmem:[#allocation5 + $0x50] sm:$0xff]  }
 0x16e   : > { %1003 = vmatprep.mubr.bf16.mxu0 %v783_v6  ;;  %3691 = vmatpush3.bf16.msra.mxu0 %v3945_v4 }
 0x16f   : > { %3692 = vmatprep.subr.bf16.mxu0 %v4465_v0  ;;  %v760_v9 = vpop.permute.xlu0 %759  ;;  %3517 = vmatpush3.bf16.msra.mxu1 %v3949_v15 }
 0x170   : > { %v787_v11 = vsel %vm767_vm3, %v741_v58, %v760_v9  ;;  %v736_v12 = vpop.permute.xlu1 %735  ;;  %3518 = vmatprep.subr.bf16.mxu1 %v3950_v2 }
 0x171   : > { %v775_v13 = vsel %vm767_vm3, %v4821_v3, %v736_v12  ;;  %v3953_v3 = vld [vmem:[#allocation5 + $0x58] sm:$0xff]  }
 0x172   : > { %3693 = vmatpush3.bf16.msra.mxu0 %v3948_v14 }
 0x173   : > { %3694 = vmatprep.subr.bf16.mxu0 %v4465_v0  ;;  %3519 = vmatpush3.bf16.msra.mxu1 %v3952_v17 }
 0x174   : > { %3520 = vmatprep.subr.bf16.mxu1 %v3953_v3 }
 0x175   : > { %1004 = vmatmul.mubr.bf16.gmra.mrb[4].mxu0 %v772_v10 }
 0x176   : > { %1011 = vmatprep.mubr.bf16.mxu0 %v787_v11  ;;  %3695 = vmatpush3.bf16.msra.mxu0 %v3951_v16 }
 0x177   : > { %3696 = vmatprep.subr.bf16.mxu0 %v4465_v0  ;;  %3521 = vmatpush3.bf16.msra.mxu1 %v3955_v19 }
 0x178   : > { %3522 = vmatprep.subr.bf16.mxu1 %v3956_v20 }
 0x17a   : > { %3697 = vmatpush3.bf16.msra.mxu0 %v3954_v18 }
 0x17b   : > { %3698 = vmatprep.subr.bf16.mxu0 %v4465_v0  ;;  %3523 = vmatpush3.bf16.msra.mxu1 %v3958_v22 }
 0x17c   : > { %3524 = vmatprep.subr.bf16.mxu1 %v3959_v23 }
 0x17d   : > { %1012 = vmatmul.mubr.bf16.gmra.mrb[8].mxu0 %v775_v13 }
 0x17e   : > { %3706 = vmatprep.mubr.msk.bf16.mxu0 %vm4467_vm2, %v4465_v0  ;;  %3699 = vmatpush3.bf16.msra.mxu0 %v3957_v21 }
 0x17f   : > { %3700 = vmatprep.subr.bf16.mxu0 %v4465_v0  ;;  %3525 = vmatpush3.bf16.msra.mxu1 %v3961_v25 }
 0x180   : > { %3526 = vmatprep.subr.bf16.mxu1 %v3962_v26 }
 0x182   : > { %3701 = vmatpush3.bf16.msra.mxu0 %v3960_v24 }
 0x183   : > { %3702 = vmatprep.subr.bf16.mxu0 %v4465_v0  ;;  %3527 = vmatpush3.bf16.msra.mxu1 %v3964_v28 }
 0x184   : > { %3528 = vmatprep.subr.bf16.mxu1 %v3965_v29 }
 0x186   : > { %3703 = vmatpush3.bf16.msra.mxu0 %v3963_v27 }
 0x187   : > { %3704 = vmatprep.subr.bf16.mxu0 %v4465_v0  ;;  %3529 = vmatpush3.bf16.msra.mxu1 %v3967_v31 }
 0x18a   : > { %3705 = vmatpush3.bf16.msra.mxu0 %v3966_v30 }
 0x1cd   : > { %v1054_v32 = vpop.f32.mrb[0].mxu1 }
 0x1ce   : > { %v3680_v33 = vpop.f32.mrb[1].mxu1 }
 0x1cf   : > { %v1057_v34 = vpop.f32.mrb[2].mxu1 }
 0x1d0   : > { %v3681_v35 = vpop.f32.mrb[3].mxu1 }
 0x1d5   : > { %v1062_v36 = vpop.f32.mrb[4].mxu1 }
 0x1d6   : > { %v3684_v37 = vpop.f32.mrb[5].mxu1 }
 0x1d7   : > { %v1065_v38 = vpop.f32.mrb[6].mxu1 }
 0x1d8   : > { %v3685_v39 = vpop.f32.mrb[7].mxu1 }
 0x1d9   : > { %v3969_v39 = vld [vmem:[#allocation7] sm:$0xff]  }
 0x1dd   : > { %v1070_v40 = vpop.f32.mrb[8].mxu1 }
 0x1de   : > { %v3688_v41 = vpop.f32.mrb[9].mxu1 }
 0x1df   : > { %v1073_v42 = vpop.f32.mrb[10].mxu1  ;;  %v3971_v41 = vld [vmem:[#allocation7 + $0x48] sm:$0xff]  }
 0x1e0   : > { %v3689_v43 = vpop.f32.mrb[11].mxu1 }
 0x1e1   : > { %v3973_v43 = vld [vmem:[#allocation7 + $0x88] sm:$0xff]  }
 0x240   : > { %v3489_v44 = vpop.f32.mrb[0].mxu0 }
 0x241   : > { %v3490_v45 = vpop.f32.mrb[1].mxu0 }
 0x242   : > { %v3491_v47 = vadd.f32 %v3490_v45, %v3489_v44  ;;  %v3492_v48 = vpop.f32.mrb[2].mxu0  ;;  %v3974_v44 = vld [vmem:[#allocation7 + $0x50] sm:$0xff]  }
 0x243   : > { %v3493_v49 = vpop.f32.mrb[3].mxu0  ;;  %v3975_v45 = vld [vmem:[#allocation7 + $0x10] sm:$0xff]  }
 0x244   : > { %v998_v50 = vadd.f32 %v3491_v47, %v3267_v46  ;;  %v3494_v51 = vadd.f32 %v3493_v49, %v3492_v48  ;;  %v3977_v47 = vld [vmem:[#allocation7 + $0x58] sm:$0xff]  }
 0x245   : > { %v3978_v48 = vld [vmem:[#allocation7 + $0x18] sm:$0xff]  }
 0x246   : > { %v1055_v52 = vadd.f32 %v1054_v32, %v998_v50  ;;  %v1001_v53 = vadd.f32 %v3494_v51, %v3267_v46  ;;  %v3979_v49 = vld [vmem:[#allocation7 + $0x98] sm:$0xff]   ;;  %v3980_v50 = vld [vmem:[#allocation7 + $0x60] sm:$0xff]  }
 0x247   : > { %v3981_v51 = vld [vmem:[#allocation7 + $0x20] sm:$0xff]  }
 0x248   : > { %v1077_v54 = vmax.f32 %v1055_v52, 0.0  ;;  %v1058_v55 = vadd.f32 %v1057_v34, %v1001_v53  ;;  %v3495_v56 = vpop.f32.mrb[4].mxu0  ;;  %v3982_v52 = vld [vmem:[#allocation7 + $0xa0] sm:$0xff]   ;;  %v3983_v53 = vld [vmem:[#allocation7 + $0x68] sm:$0xff]  }
 0x249   : > { %v3496_v58 = vpop.f32.mrb[5].mxu0 }
 0x24a   : > { %v1078_v59 = vmax.f32 %v1058_v55, 0.0  ;;  %v3497_v60 = vadd.f32 %v3496_v58, %v3495_v56  ;;  %v3498_v61 = vpop.f32.mrb[6].mxu0  ;;  %v1088_v63 = vadd.f32 %v3291_v57, %v1077_v54  ;;  %v3984_v54 = vld [vmem:[#allocation7 + $0x28] sm:$0xff]   ;;  %v3986_v56 = vld [vmem:[#allocation7 + $0x70] sm:$0xff]  }
 0x24b   : > { %v3499_v62 = vpop.f32.mrb[7].mxu0  ;;  %v3985_v55 = vld [vmem:[#allocation7 + $0xa8] sm:$0xff]   ;;  %v3988_v58 = vld [vmem:[#allocation7 + $0xb0] sm:$0xff]  }
 0x24c   : > { %v1089_v4 = vadd.f32 %v3291_v57, %v1078_v59  ;;  %v1006_v5 = vadd.f32 %v3497_v60, %v3267_v46  ;;  %v3500_v6 = vadd.f32 %v3499_v62, %v3498_v61  ;;  %v3989_v59 = vld [vmem:[#allocation7 + $0x78] sm:$0xff]   ;;  %v4888_v62 = vld [vmem:[#allocation8] sm:$0xff]  }
 0x24d   : > { %v3990_v60 = vld [vmem:[#allocation7 + $0x38] sm:$0xff]  }
 0x24e   : > { %v1094_v7 = vpack.c.bf16 %v1089_v4, %v1088_v63  ;;  %v1063_v8 = vadd.f32 %v1062_v36, %v1006_v5  ;;  %v1009_v9 = vadd.f32 %v3500_v6, %v3267_v46  ;;  %v3991_v61 = vld [vmem:[#allocation7 + $0xb8] sm:$0xff]   ;;  %v3292_v6 = vld [vmem:[%s5124_s4] ss:$0 sm:$0xff] }
 0x250   : > { %v1079_v10 = vmax.f32 %v1063_v8, 0.0  ;;  %v1066_v11 = vadd.f32 %v1065_v38, %v1009_v9  ;;  %v3501_v12 = vpop.f32.mrb[8].mxu0  ;;  %v1108_v22 = vrot.slane %v1094_v7, 2  ;;  %v1100_v23 = vrot.slane %v1094_v7, 1  ;;  %v3968_v38 = vld [vmem:[#allocation7 + $0x40] sm:$0xff]  }
 0x251   : > { %v3502_v13 = vpop.f32.mrb[9].mxu0  ;;  %3559 = vmatprep.subr.bf16.mxu1 %v3968_v38 }
 0x252   : > { %v1080_v1 = vmax.f32 %v1066_v11, 0.0  ;;  %v3503_v14 = vadd.f32 %v3502_v13, %v3501_v12  ;;  %v3504_v15 = vpop.f32.mrb[10].mxu0  ;;  %v1090_v16 = vadd.f32 %v3291_v57, %v1079_v10 }
 0x253   : > { %v3505_v2 = vpop.f32.mrb[11].mxu0 }
 0x254   : > { %v1091_v17 = vadd.f32 %v3291_v57, %v1080_v1  ;;  %v1014_v3 = vadd.f32 %v3503_v14, %v3267_v46  ;;  %v3506_v18 = vadd.f32 %v3505_v2, %v3504_v15 }
 0x256   : > { %v1095_v19 = vpack.c.bf16 %v1091_v17, %v1090_v16  ;;  %v1071_v20 = vadd.f32 %v1070_v40, %v1014_v3  ;;  %v1017_v21 = vadd.f32 %v3506_v18, %v3267_v46  ;;  %v3970_v40 = vld [vmem:[#allocation7 + $0x80] sm:$0xff]   ;;  %v3976_v46 = vld [vmem:[#allocation7 + $0x90] sm:$0xff]  }
 0x257   : > { %3718 = vmatprep.subr.bf16.mxu0 %v3970_v40 }
 0x258   : > { %v1109_v24 = vrot.slane %v1095_v19, 2  ;;  %v1081_v25 = vmax.f32 %v1071_v20, 0.0  ;;  %v1074_v26 = vadd.f32 %v1073_v42, %v1017_v21  ;;  %v1101_v27 = vrot.slane %v1095_v19, 1  ;;  %v3972_v42 = vld [vmem:[#allocation7 + $0x8] sm:$0xff]  }
 0x25a   : > { %v1082_v28 = vmax.f32 %v1074_v26, 0.0  ;;  %v1102_v29 = vsel %vm737_vm5, %v1100_v23, %v1101_v27  ;;  %v1110_v30 = vsel %vm761_vm4, %v1108_v22, %v1109_v24  ;;  %v1092_v31 = vadd.f32 %v3291_v57, %v1081_v25 }
 0x25b   : > { %1345 = vmatprep.mubr.bf16.mxu1 %v1102_v29  ;;  %3707 = vmatmul.mubr.bf16.vlgmr.msra.gmra.mrb[12].mxu0 %v1110_v30 }
 0x25c   : > { %v1093_v32 = vadd.f32 %v3291_v57, %v1082_v28  ;;  %1346 = vmatmul.mubr.bf16.vlgmr.msra.gmra.mrb[12].mxu1 %v1094_v7  ;;  %3710 = vmatprep.mubr.msk.bf16.mxu0 %vm4467_vm2, %v4465_v0  ;;  %v3987_v57 = vld [vmem:[#allocation7 + $0x30] sm:$0xff]  }
 0x25d   : > { %3560 = vmatpush3.bf16.msra.mxu1 %v3969_v39  ;;  %3719 = vmatpush3.bf16.msra.mxu0 %v3970_v40 }
 0x25e   : > { %v1096_v33 = vpack.c.bf16 %v1093_v32, %v1092_v31  ;;  %3561 = vmatprep.subr.bf16.mxu1 %v3971_v41  ;;  %3720 = vmatprep.subr.bf16.mxu0 %v3973_v43 }
 0x260   : > { %v1103_v34 = vrot.slane %v1096_v33, 1  ;;  %v1111_v35 = vrot.slane %v1096_v33, 2 }
 0x261   : > { %3562 = vmatpush3.bf16.msra.mxu1 %v3972_v42  ;;  %3721 = vmatpush3.bf16.msra.mxu0 %v3973_v43 }
 0x262   : > { %v1104_v36 = vsel %vm737_vm5, %v1101_v27, %v1103_v34  ;;  %v1112_v37 = vsel %vm761_vm4, %v1109_v24, %v1111_v35  ;;  %3563 = vmatprep.subr.bf16.mxu1 %v3974_v44  ;;  %3722 = vmatprep.subr.bf16.mxu0 %v3976_v46 }
 0x263   : > { %1353 = vmatprep.mubr.bf16.mxu1 %v1104_v36  ;;  %3711 = vmatmul.mubr.bf16.gmra.mrb[16].mxu0 %v1112_v37 }
 0x264   : > { %1354 = vmatmul.mubr.bf16.gmra.mrb[16].mxu1 %v1095_v19  ;;  %3714 = vmatprep.mubr.msk.bf16.mxu0 %vm4467_vm2, %v4465_v0  ;;  %v3317_v19 = vld [vmem:[%s5124_s4 + $0x1] ss:$0 sm:$0xff] }
 0x265   : > { %1361 = vmatprep.mubr.bf16.mxu1 %v1103_v34  ;;  %3564 = vmatpush3.bf16.msra.mxu1 %v3975_v45 }
 0x266   : > { %3723 = vmatpush3.bf16.msra.mxu0 %v3976_v46  ;;  %3565 = vmatprep.subr.bf16.mxu1 %v3977_v47 }
 0x267   : > { %3724 = vmatprep.subr.bf16.mxu0 %v3979_v49 }
 0x269   : > { %3566 = vmatpush3.bf16.msra.mxu1 %v3978_v48 }
 0x26a   : > { %3725 = vmatpush3.bf16.msra.mxu0 %v3979_v49  ;;  %3567 = vmatprep.subr.bf16.mxu1 %v3980_v50 }
 0x26b   : > { %3715 = vmatmul.mubr.bf16.gmra.mrb[20].mxu0 %v1111_v35  ;;  %3726 = vmatprep.subr.bf16.mxu0 %v3982_v52 }
 0x26c   : > { %1362 = vmatmul.mubr.bf16.gmra.mrb[20].mxu1 %v1096_v33 }
 0x26d   : > { %3568 = vmatpush3.bf16.msra.mxu1 %v3981_v51 }
 0x26e   : > { %3727 = vmatpush3.bf16.msra.mxu0 %v3982_v52  ;;  %3569 = vmatprep.subr.bf16.mxu1 %v3983_v53 }
 0x26f   : > { %3728 = vmatprep.subr.bf16.mxu0 %v3985_v55 }
 0x271   : > { %3570 = vmatpush3.bf16.msra.mxu1 %v3984_v54 }
 0x272   : > { %3729 = vmatpush3.bf16.msra.mxu0 %v3985_v55  ;;  %3571 = vmatprep.subr.bf16.mxu1 %v3986_v56 }
 0x273   : > { %3730 = vmatprep.subr.bf16.mxu0 %v3988_v58 }
 0x275   : > { %3572 = vmatpush3.bf16.msra.mxu1 %v3987_v57 }
 0x276   : > { %3731 = vmatpush3.bf16.msra.mxu0 %v3988_v58  ;;  %3573 = vmatprep.subr.bf16.mxu1 %v3989_v59 }
 0x277   : > { %3732 = vmatprep.subr.bf16.mxu0 %v3991_v61 }
 0x279   : > { %3574 = vmatpush3.bf16.msra.mxu1 %v3990_v60 }
 0x27a   : > { %3733 = vmatpush3.bf16.msra.mxu0 %v3991_v61  ;;  %3738 = vmatprep.subr.bf16.mxu1 %v4888_v62 }
 0x32e   : > { %v1403_v63 = vpop.f32.mrb[12].mxu0 }
 0x32f   : > { %v3530_v4 = vpop.f32.mrb[12].mxu1  ;;  %v3708_v5 = vpop.f32.mrb[13].mxu0 }
 0x330   : > { %v3531_v7 = vpop.f32.mrb[13].mxu1  ;;  %v1406_v8 = vpop.f32.mrb[14].mxu0 }
 0x331   : > { %v3532_v9 = vadd.f32 %v3531_v7, %v3530_v4  ;;  %v3533_v10 = vpop.f32.mrb[14].mxu1  ;;  %v3709_v11 = vpop.f32.mrb[15].mxu0 }
 0x332   : > { %v3534_v12 = vpop.f32.mrb[15].mxu1 }
 0x333   : > { %v1348_v13 = vadd.f32 %v3532_v9, %v3292_v6  ;;  %v3535_v1 = vadd.f32 %v3534_v12, %v3533_v10  ;;  %v3993_v12 = vld [vmem:[#allocation8 + $0x8] sm:$0xff]  }
 0x335   : > { %v1404_v14 = vadd.f32 %v1403_v63, %v1348_v13  ;;  %v1351_v15 = vadd.f32 %v3535_v1, %v3292_v6 }
 0x336   : > { %v1411_v2 = vpop.f32.mrb[16].mxu0 }
 0x337   : > { %v1425_v16 = vmax.f32 %v1404_v14, 0.0  ;;  %v1407_v17 = vadd.f32 %v1406_v8, %v1351_v15  ;;  %v3536_v3 = vpop.f32.mrb[16].mxu1  ;;  %v3712_v18 = vpop.f32.mrb[17].mxu0 }
 0x338   : > { %v3537_v20 = vpop.f32.mrb[17].mxu1  ;;  %v1414_v21 = vpop.f32.mrb[18].mxu0  ;;  %v3997_v18 = vld [vmem:[#allocation8 + $0x28] sm:$0xff]  }
 0x339   : > { %v1426_v22 = vmax.f32 %v1407_v17, 0.0  ;;  %v3538_v23 = vadd.f32 %v3537_v20, %v3536_v3  ;;  %v3539_v24 = vpop.f32.mrb[18].mxu1  ;;  %v3713_v25 = vpop.f32.mrb[19].mxu0  ;;  %v1435_v27 = vadd.f32 %v3317_v19, %v1425_v16  ;;  %v3994_v16 = vld [vmem:[#allocation8 + $0x10] sm:$0xff]   ;;  %v3995_v17 = vld [vmem:[#allocation8 + $0x18] sm:$0xff]   ;;  %v3996_v3 = vld [vmem:[#allocation8 + $0x20] sm:$0xff]  }
 0x33a   : > { %v3540_v26 = vpop.f32.mrb[19].mxu1  ;;  %v4000_v20 = vld [vmem:[#allocation10] sm:$0xff]  }
 0x33b   : > { %v1436_v28 = vadd.f32 %v3317_v19, %v1426_v22  ;;  %v1356_v29 = vadd.f32 %v3538_v23, %v3292_v6  ;;  %v3541_v30 = vadd.f32 %v3540_v26, %v3539_v24  ;;  %3758 = vmatprep.subr.bf16.mxu0 %v4000_v20  ;;  %v4002_v22 = vld [vmem:[#allocation10 + $0x10] sm:$0xff]   ;;  %v4003_v23 = vld [vmem:[#allocation10 + $0x18] sm:$0xff]   ;;  %v4004_v24 = vld [vmem:[#allocation10 + $0x20] sm:$0xff]  }
 0x33d   : > { %v1440_v31 = vpack.c.bf16 %v1436_v28, %v1435_v27  ;;  %v1412_v32 = vadd.f32 %v1411_v2, %v1356_v29  ;;  %v1359_v33 = vadd.f32 %v3541_v30, %v3292_v6  ;;  %v3318_v28 = vld [vmem:[%s5126_s6] ss:$0 sm:$0xff] }
 0x33e   : > { %v1419_v34 = vpop.f32.mrb[20].mxu0 }
 0x33f   : > { %v1427_v35 = vmax.f32 %v1412_v32, 0.0  ;;  %v1415_v36 = vadd.f32 %v1414_v21, %v1359_v33  ;;  %v3542_v37 = vpop.f32.mrb[20].mxu1  ;;  %v3716_v38 = vpop.f32.mrb[21].mxu0  ;;  %v1444_v46 = vshrl.u32 %v1440_v31, 16  ;;  %v1447_v47 = vshll.u32 %v1440_v31, 16  ;;  %v4001_v21 = vld [vmem:[#allocation10 + $0x8] sm:$0xff]  }
 0x340   : > { %v3543_v39 = vpop.f32.mrb[21].mxu1  ;;  %v1422_v40 = vpop.f32.mrb[22].mxu0  ;;  %v1475_v53 = vrot.slane %v1440_v31, 3 }
 0x341   : > { %v1428_v41 = vmax.f32 %v1415_v36, 0.0  ;;  %v3544_v42 = vadd.f32 %v3543_v39, %v3542_v37  ;;  %v3545_v43 = vpop.f32.mrb[22].mxu1  ;;  %v3717_v44 = vpop.f32.mrb[23].mxu0  ;;  %v1437_v48 = vadd.f32 %v3317_v19, %v1427_v35  ;;  %v1446_v54 = vrot.slane %v1444_v46, 1 }
 0x342   : > { %v3546_v45 = vpop.f32.mrb[23].mxu1  ;;  %v1449_v55 = vrot.slane %v1447_v47, 2 }
 0x343   : > { %v1438_v49 = vadd.f32 %v3317_v19, %v1428_v41  ;;  %v1364_v50 = vadd.f32 %v3544_v42, %v3292_v6  ;;  %v3343_v42 = vld [vmem:[%s5126_s6 + $0x1] ss:$0 sm:$0xff] }
 0x344   : > { %v1450_v7 = vor.u32 %v1449_v55, %v1446_v54 }
 0x345   : > { %v1441_v51 = vpack.c.bf16 %v1438_v49, %v1437_v48  ;;  %v1420_v52 = vadd.f32 %v1419_v34, %v1364_v50 }
 0x347   : > { %v1429_v56 = vmax.f32 %v1420_v52, 0.0  ;;  %v1476_v57 = vrot.slane %v1441_v51, 3  ;;  %v1452_v58 = vshrl.u32 %v1441_v51, 16  ;;  %v1455_v59 = vshll.u32 %v1441_v51, 16 }
 0x349   : > { %v1439_v60 = vadd.f32 %v3317_v19, %v1429_v56  ;;  %v1477_v61 = vsel %vm1474_vm6, %v1475_v53, %v1476_v57  ;;  %v1454_v63 = vrot.slane %v1452_v58, 1  ;;  %v1457_v4 = vrot.slane %v1455_v59, 2  ;;  %v3999_v19 = vld [vmem:[#allocation8 + $0x38] sm:$0xff]  }
 0x34a   : > { %3734 = vmatprep.mubr.bf16.mxu0 %v1477_v61  ;;  %v4005_v61 = vld [vmem:[#allocation10 + $0x28] sm:$0xff]  }
 0x34b   : > { %v1442_v5 = vpack.c.bf16 %v1439_v60, %v1439_v60  ;;  %v1458_v8 = vor.u32 %v1457_v4, %v1454_v63  ;;  %v4006_v63 = vld [vmem:[#allocation10 + $0x30] sm:$0xff]   ;;  %v4007_v4 = vld [vmem:[#allocation10 + $0x38] sm:$0xff]  }
 0x34d   : > { %v1459_v6 = vsel %vm743_vm0, %v1450_v7, %v1458_v8  ;;  %v1478_v9 = vrot.slane %v1442_v5, 3  ;;  %v1461_v10 = vshrl.u32 %v1442_v5, 16  ;;  %v1464_v11 = vshll.u32 %v1442_v5, 16  ;;  %v4008_v5 = vld [vmem:[#allocation11] ss:$16 sps:$4 sm:$0xff]  }
 0x34e   : > { %1711 = vmatprep.mubr.bf16.mxu1 %v1459_v6  ;;  %v4010_v7 = vld [vmem:[#allocation11 + $0x4] ss:$16 sps:$4 sm:$0xff]  }
 0x34f   : > { %1712 = vmatmul.mubr.bf16.vlgmr.msra.gmra.mrb[24].mxu1 %v1440_v31  ;;  %v1479_v13 = vsel %vm1474_vm6, %v1476_v57, %v1478_v9  ;;  %v1463_v1 = vrot.slane %v1461_v10, 1  ;;  %v1466_v14 = vrot.slane %v1464_v11, 2  ;;  %v4016_v6 = vld [vmem:[#allocation11 + $0x24] ss:$16 sps:$4 sm:$0xff]   ;;  %v4014_v9 = vld [vmem:[#allocation11 + $0x20] ss:$16 sps:$4 sm:$0xff]  }
 0x350   : > { %3735 = vmatmul.mubr.bf16.vlgmr.msra.gmra.mrb[24].mxu0 %v1479_v13  ;;  %3739 = vmatpush3.bf16.msra.mxu1 %v4888_v62  ;;  %v3998_v62 = vld [vmem:[#allocation8 + $0x30] sm:$0xff]   ;;  %v3344_v10 = vld [vmem:[%s5128_s8] ss:$0 sm:$0xff] }
 0x351   : > { %v1467_v15 = vor.u32 %v1466_v14, %v1463_v1  ;;  %3740 = vmatprep.subr.bf16.mxu1 %v3993_v12  ;;  %3759 = vmatpush3.bf16.msra.mxu0 %v4000_v20 }
 0x352   : > { %3760 = vmatprep.subr.bf16.mxu0 %v4001_v21 }
 0x353   : > { %v1468_v2 = vsel %vm743_vm0, %v1458_v8, %v1467_v15  ;;  %v4013_v8 = vld [vmem:[#allocation11 + $0xc] ss:$16 sps:$4 sm:$0xff]  }
 0x354   : > { %1719 = vmatprep.mubr.bf16.mxu1 %v1468_v2  ;;  %3741 = vmatpush3.bf16.msra.mxu1 %v3993_v12 }
 0x355   : > { %3742 = vmatprep.subr.bf16.mxu1 %v3994_v16  ;;  %3761 = vmatpush3.bf16.msra.mxu0 %v4001_v21 }
 0x356   : > { %3762 = vmatprep.subr.bf16.mxu0 %v4002_v22 }
 0x357   : > { %1720 = vmatmul.mubr.bf16.gmra.mrb[28].mxu1 %v1441_v51 }
 0x358   : > { %3743 = vmatpush3.bf16.msra.mxu1 %v3994_v16 }
 0x359   : > { %3744 = vmatprep.subr.bf16.mxu1 %v3995_v17  ;;  %3763 = vmatpush3.bf16.msra.mxu0 %v4002_v22 }
 0x35a   : > { %3764 = vmatprep.subr.bf16.mxu0 %v4003_v23 }
 0x35c   : > { %3745 = vmatpush3.bf16.msra.mxu1 %v3995_v17  ;;  %v3353_v17 = vld [vmem:[%s5128_s8 + $0x1] ss:$0 sm:$0xff] }
 0x35d   : > { %3746 = vmatprep.subr.bf16.mxu1 %v3996_v3  ;;  %3765 = vmatpush3.bf16.msra.mxu0 %v4003_v23 }
 0x35e   : > { %3766 = vmatprep.subr.bf16.mxu0 %v4004_v24 }
 0x360   : > { %3747 = vmatpush3.bf16.msra.mxu1 %v3996_v3 }
 0x361   : > { %3748 = vmatprep.subr.bf16.mxu1 %v3997_v18  ;;  %3767 = vmatpush3.bf16.msra.mxu0 %v4004_v24 }
 0x362   : > { %3768 = vmatprep.subr.bf16.mxu0 %v4005_v61 }
 0x364   : > { %3749 = vmatpush3.bf16.msra.mxu1 %v3997_v18 }
 0x365   : > { %3750 = vmatprep.subr.bf16.mxu1 %v3998_v62  ;;  %3769 = vmatpush3.bf16.msra.mxu0 %v4005_v61  ;;  %v4070_v61 = vld [vmem:[#allocation11 + $0x144] ss:$16 sps:$4 sm:$0xff]  }
 0x366   : > { %3770 = vmatprep.subr.bf16.mxu0 %v4006_v63 }
 0x368   : > { %3751 = vmatpush3.bf16.msra.mxu1 %v3998_v62 }
 0x369   : > { %3752 = vmatprep.subr.bf16.mxu1 %v3999_v19  ;;  %3771 = vmatpush3.bf16.msra.mxu0 %v4006_v63  ;;  %v4073_v63 = vld [vmem:[#allocation11 + $0x14c] ss:$16 sps:$4 sm:$0xff]  }
 0x36a   : > { %3772 = vmatprep.subr.bf16.mxu0 %v4007_v4 }
 0x36c   : > { %3753 = vmatpush3.bf16.msra.mxu1 %v3999_v19 }
 0x36d   : > { %3773 = vmatpush3.bf16.msra.mxu0 %v4007_v4  ;;  %2498 = vmatprep.subr.bf16.mxu1 %v4010_v7  ;;  %v4068_v4 = vld [vmem:[#allocation11 + $0x140] ss:$16 sps:$4 sm:$0xff]   ;;  %v4076_v7 = vld [vmem:[#allocation11 + $0x164] ss:$16 sps:$4 sm:$0xff]  }
 0x36e   : > { %2539 = vmatprep.subr.bf16.mxu0 %v4013_v8  ;;  %v4079_v8 = vld [vmem:[#allocation11 + $0x16c] ss:$16 sps:$4 sm:$0xff]  }
 0x422   : > { %v3575_v25 = vpop.f32.mrb[24].mxu1 }
 0x423   : > { %v3576_v26 = vpop.f32.mrb[25].mxu1  ;;  %v3736_v27 = vpop.f32.mrb[24].mxu0 }
 0x424   : > { %v3577_v29 = vadd.f32 %v3576_v26, %v3575_v25  ;;  %v3578_v30 = vpop.f32.mrb[26].mxu1  ;;  %v1762_v31 = vpop.f32.mrb[25].mxu0  ;;  %v4011_v26 = vld [vmem:[#allocation11 + $0x8] ss:$16 sps:$4 sm:$0xff]  }
 0x425   : > { %v3579_v32 = vpop.f32.mrb[27].mxu1  ;;  %v3737_v33 = vpop.f32.mrb[26].mxu0 }
 0x426   : > { %v1714_v34 = vadd.f32 %v3577_v29, %v3318_v28  ;;  %v3580_v35 = vadd.f32 %v3579_v32, %v3578_v30  ;;  %v1765_v36 = vpop.f32.mrb[27].mxu0  ;;  %v4022_v29 = vld [vmem:[#allocation11 + $0x44] ss:$16 sps:$4 sm:$0xff]   ;;  %v4025_v30 = vld [vmem:[#allocation11 + $0x4c] ss:$16 sps:$4 sm:$0xff]  }
 0x427   : > { %v4023_v32 = vld [vmem:[#allocation11 + $0x48] ss:$16 sps:$4 sm:$0xff]  }
 0x428   : > { %v1763_v37 = vadd.f32 %v1762_v31, %v1714_v34  ;;  %v1717_v38 = vadd.f32 %v3580_v35, %v3318_v28  ;;  %v4020_v31 = vld [vmem:[#allocation11 + $0x40] ss:$16 sps:$4 sm:$0xff]   ;;  %v4031_v34 = vld [vmem:[#allocation11 + $0x6c] ss:$16 sps:$4 sm:$0xff]  }
 0x429   : > { %v4026_v35 = vld [vmem:[#allocation11 + $0x60] ss:$16 sps:$4 sm:$0xff]  }
 0x42a   : > { %v1777_v39 = vmax.f32 %v1763_v37, 0.0  ;;  %v1766_v40 = vadd.f32 %v1765_v36, %v1717_v38  ;;  %v3581_v41 = vpop.f32.mrb[28].mxu1  ;;  %v4029_v36 = vld [vmem:[#allocation11 + $0x68] ss:$16 sps:$4 sm:$0xff]   ;;  %v4034_v37 = vld [vmem:[#allocation11 + $0x84] ss:$16 sps:$4 sm:$0xff]  }
 0x42b   : > { %v3582_v43 = vpop.f32.mrb[29].mxu1  ;;  %v4037_v38 = vld [vmem:[#allocation11 + $0x8c] ss:$16 sps:$4 sm:$0xff]  }
 0x42c   : > { %v1778_v44 = vmax.f32 %v1766_v40, 0.0  ;;  %v3583_v45 = vadd.f32 %v3582_v43, %v3581_v41  ;;  %v3584_v46 = vpop.f32.mrb[30].mxu1  ;;  %v1786_v48 = vadd.f32 %v3343_v42, %v1777_v39  ;;  %v4032_v39 = vld [vmem:[#allocation11 + $0x80] ss:$16 sps:$4 sm:$0xff]   ;;  %v4035_v40 = vld [vmem:[#allocation11 + $0x88] ss:$16 sps:$4 sm:$0xff]  }
 0x42d   : > { %v3585_v47 = vpop.f32.mrb[31].mxu1  ;;  %v4040_v41 = vld [vmem:[#allocation11 + $0xa4] ss:$16 sps:$4 sm:$0xff]   ;;  %v4038_v43 = vld [vmem:[#allocation11 + $0xa0] ss:$16 sps:$4 sm:$0xff]  }
 0x42e   : > { %v1787_v49 = vadd.f32 %v3343_v42, %v1778_v44  ;;  %v1722_v50 = vadd.f32 %v3583_v45, %v3318_v28  ;;  %v3586_v51 = vadd.f32 %v3585_v47, %v3584_v46  ;;  %v4041_v44 = vld [vmem:[#allocation11 + $0xa8] ss:$16 sps:$4 sm:$0xff]   ;;  %v4046_v45 = vld [vmem:[#allocation11 + $0xc4] ss:$16 sps:$4 sm:$0xff]   ;;  %v4049_v46 = vld [vmem:[#allocation11 + $0xcc] ss:$16 sps:$4 sm:$0xff]  }
 0x42f   : > { %v4044_v47 = vld [vmem:[#allocation11 + $0xc0] ss:$16 sps:$4 sm:$0xff]  }
 0x430   : > { %v1771_v52 = vadd.f32 %v3736_v27, %v1722_v50  ;;  %v1725_v53 = vadd.f32 %v3586_v51, %v3318_v28  ;;  %v1790_v54 = vpack.c.bf16 %v1787_v49, %v1786_v48  ;;  %v4019_v27 = vld [vmem:[#allocation11 + $0x2c] ss:$16 sps:$4 sm:$0xff]   ;;  %v4017_v28 = vld [vmem:[#allocation11 + $0x28] ss:$16 sps:$4 sm:$0xff]   ;;  %v4052_v49 = vld [vmem:[#allocation11 + $0xe4] ss:$16 sps:$4 sm:$0xff]  }
 0x431   : > { %v4047_v48 = vld [vmem:[#allocation11 + $0xc8] ss:$16 sps:$4 sm:$0xff]   ;;  %v4055_v50 = vld [vmem:[#allocation11 + $0xec] ss:$16 sps:$4 sm:$0xff]   ;;  %v4050_v51 = vld [vmem:[#allocation11 + $0xe0] ss:$16 sps:$4 sm:$0xff]  }
 0x432   : > { %v1779_v55 = vmax.f32 %v1771_v52, 0.0  ;;  %v1774_v56 = vadd.f32 %v3737_v33, %v1725_v53  ;;  %3754 = vmatprep.mubr.bf16.mxu1 %v1790_v54  ;;  %v4028_v33 = vld [vmem:[#allocation11 + $0x64] ss:$16 sps:$4 sm:$0xff]   ;;  %v4053_v52 = vld [vmem:[#allocation11 + $0xe8] ss:$16 sps:$4 sm:$0xff]  }
 0x433   : > { %v4058_v53 = vld [vmem:[#allocation11 + $0x104] ss:$16 sps:$4 sm:$0xff]   ;;  %v4061_v54 = vld [vmem:[#allocation11 + $0x10c] ss:$16 sps:$4 sm:$0xff]  }
 0x434   : > { %v1780_v57 = vmax.f32 %v1774_v56, 0.0  ;;  %v1788_v58 = vadd.f32 %v3343_v42, %v1779_v55  ;;  %v4056_v55 = vld [vmem:[#allocation11 + $0x100] ss:$16 sps:$4 sm:$0xff]   ;;  %v4059_v56 = vld [vmem:[#allocation11 + $0x108] ss:$16 sps:$4 sm:$0xff]  }
 0x436   : > { %v1789_v59 = vadd.f32 %v3343_v42, %v1780_v57  ;;  %v4043_v42 = vld [vmem:[#allocation11 + $0xac] ss:$16 sps:$4 sm:$0xff]   ;;  %v4064_v57 = vld [vmem:[#allocation11 + $0x124] ss:$16 sps:$4 sm:$0xff]  }
 0x438   : > { %v1791_v60 = vpack.c.bf16 %v1789_v59, %v1788_v58  ;;  %v4067_v58 = vld [vmem:[#allocation11 + $0x12c] ss:$16 sps:$4 sm:$0xff]   ;;  %v4062_v59 = vld [vmem:[#allocation11 + $0x120] ss:$16 sps:$4 sm:$0xff]  }
 0x43a   : > { %3755 = vmatmul.mubr.bf16.vlgmr.msra.gmra.mrb[32].mxu1 %v1791_v60  ;;  %v4065_v60 = vld [vmem:[#allocation11 + $0x128] ss:$16 sps:$4 sm:$0xff]  }
 0x43b   : > { %2499 = vmatpush1.bf16.msra.mxu1 %v4008_v5  ;;  %v4071_v5 = vld [vmem:[#allocation11 + $0x148] ss:$16 sps:$4 sm:$0xff]  }
 0x43c   : > { %2500 = vmatprep.subr.bf16.mxu1 %v4016_v6  ;;  %v4074_v6 = vld [vmem:[#allocation11 + $0x160] ss:$16 sps:$4 sm:$0xff]  }
 0x43f   : > { %2501 = vmatpush1.bf16.msra.mxu1 %v4014_v9  ;;  %v4077_v9 = vld [vmem:[#allocation11 + $0x168] ss:$16 sps:$4 sm:$0xff]  }
 0x440   : > { %2502 = vmatprep.subr.bf16.mxu1 %v4022_v29 }
 0x443   : > { %2503 = vmatpush1.bf16.msra.mxu1 %v4020_v31 }
 0x444   : > { %2504 = vmatprep.subr.bf16.mxu1 %v4028_v33 }
 0x447   : > { %2505 = vmatpush1.bf16.msra.mxu1 %v4026_v35 }
 0x448   : > { %2506 = vmatprep.subr.bf16.mxu1 %v4034_v37 }
 0x44b   : > { %2507 = vmatpush1.bf16.msra.mxu1 %v4032_v39 }
 0x44c   : > { %2508 = vmatprep.subr.bf16.mxu1 %v4040_v41 }
 0x44f   : > { %2509 = vmatpush1.bf16.msra.mxu1 %v4038_v43 }
 0x450   : > { %2510 = vmatprep.subr.bf16.mxu1 %v4046_v45 }
 0x453   : > { %2511 = vmatpush1.bf16.msra.mxu1 %v4044_v47 }
 0x454   : > { %2512 = vmatprep.subr.bf16.mxu1 %v4052_v49 }
 0x457   : > { %2513 = vmatpush1.bf16.msra.mxu1 %v4050_v51 }
 0x458   : > { %2514 = vmatprep.subr.bf16.mxu1 %v4058_v53 }
 0x45b   : > { %2515 = vmatpush1.bf16.msra.mxu1 %v4056_v55 }
 0x45c   : > { %2516 = vmatprep.subr.bf16.mxu1 %v4064_v57 }
 0x45f   : > { %2517 = vmatpush1.bf16.msra.mxu1 %v4062_v59 }
 0x460   : > { %2518 = vmatprep.subr.bf16.mxu1 %v4070_v61 }
 0x463   : > { %2519 = vmatpush1.bf16.msra.mxu1 %v4068_v4 }
 0x464   : > { %2520 = vmatprep.subr.bf16.mxu1 %v4076_v7 }
 0x467   : > { %2521 = vmatpush1.bf16.msra.mxu1 %v4074_v6 }
 0x50d   : > { %v3756_v11 = vpop.f32.mrb[32].mxu1 }
 0x50e   : > { %v1904_v12 = vadd.f32 %v3756_v11, %v3344_v10  ;;  %v1895_v13 = vpop.f32.mrb[33].mxu1  ;;  %v4085_v11 = vld [vmem:[#allocation11 + $0x18c] ss:$16 sps:$4 sm:$0xff]  }
 0x50f   : > { %v1896_v1 = vadd.f32 %v3344_v10, %v1895_v13  ;;  %v3757_v14 = vpop.f32.mrb[34].mxu1  ;;  %v4083_v13 = vld [vmem:[#allocation11 + $0x188] ss:$16 sps:$4 sm:$0xff]  }
 0x510   : > { %v1912_v15 = vmax.f32 %v1904_v12, 0.0  ;;  %v1907_v2 = vadd.f32 %v3757_v14, %v3344_v10  ;;  %v1898_v16 = vpop.f32.mrb[35].mxu1  ;;  %v4080_v12 = vld [vmem:[#allocation11 + $0x180] ss:$16 sps:$4 sm:$0xff]   ;;  %v4091_v14 = vld [vmem:[#allocation11 + $0x1ac] ss:$16 sps:$4 sm:$0xff]  }
 0x511   : > { %v1910_v3 = vmax.f32 %v1896_v1, 0.0  ;;  %v1899_v18 = vadd.f32 %v3344_v10, %v1898_v16  ;;  %v4082_v10 = vld [vmem:[#allocation11 + $0x184] ss:$16 sps:$4 sm:$0xff]  }
 0x512   : > { %v1913_v62 = vmax.f32 %v1907_v2, 0.0  ;;  %v1921_v20 = vadd.f32 %v3353_v17, %v1912_v15  ;;  %2522 = vmatprep.subr.bf16.mxu1 %v4082_v10  ;;  %v4088_v1 = vld [vmem:[#allocation11 + $0x1a4] ss:$16 sps:$4 sm:$0xff]   ;;  %v4086_v15 = vld [vmem:[#allocation11 + $0x1a0] ss:$16 sps:$4 sm:$0xff]  }
 0x513   : > { %v1911_v19 = vmax.f32 %v1899_v18, 0.0  ;;  %v1919_v22 = vadd.f32 %v3353_v17, %v1910_v3  ;;  %2523 = vmatpush1.bf16.msra.mxu1 %v4080_v12  ;;  %v4089_v2 = vld [vmem:[#allocation11 + $0x1a8] ss:$16 sps:$4 sm:$0xff]   ;;  %v4094_v16 = vld [vmem:[#allocation11 + $0x1c4] ss:$16 sps:$4 sm:$0xff]  }
 0x514   : > { %v1922_v21 = vadd.f32 %v3353_v17, %v1913_v62  ;;  %2524 = vmatprep.subr.bf16.mxu1 %v4088_v1  ;;  %v4092_v3 = vld [vmem:[#allocation11 + $0x1c0] ss:$16 sps:$4 sm:$0xff]   ;;  %v4095_v18 = vld [vmem:[#allocation11 + $0x1c8] ss:$16 sps:$4 sm:$0xff]   ;;  %v4100_v62 = vld [vmem:[#allocation11 + $0x1e4] ss:$16 sps:$4 sm:$0xff]  }
 0x515   : > { %v1920_v23 = vadd.f32 %v3353_v17, %v1911_v19  ;;  %v4097_v17 = vld [vmem:[#allocation11 + $0x1cc] ss:$16 sps:$4 sm:$0xff]  }
 0x516   : > { %v1924_v24 = vpack.c.bf16 %v1922_v21, %v1921_v20  ;;  %v4103_v19 = vld [vmem:[#allocation11 + $0x1ec] ss:$16 sps:$4 sm:$0xff]   ;;  %v4098_v20 = vld [vmem:[#allocation11 + $0x1e0] ss:$16 sps:$4 sm:$0xff]   ;;  %v4101_v21 = vld [vmem:[#allocation11 + $0x1e8] ss:$16 sps:$4 sm:$0xff]  }
 0x517   : > { %v1923_v25 = vpack.c.bf16 %v1920_v23, %v1919_v22  ;;  %2525 = vmatpush1.bf16.msra.mxu1 %v4086_v15  ;;  %v4104_v22 = vld [vmem:[%s5133_s13 + $0x40] sm:$0xff]  }
 0x518   : > { %2526 = vmatprep.subr.bf16.mxu1 %v4094_v16  ;;  %v4105_v23 = vld [vmem:[%s5133_s13 + $0xc0] sm:$0xff]  }
 0x519   : > { %3774 = vmatprep.mubr.bf16.mxu0 %v1923_v25  ;;  %v4106_v15 = vld [vmem:[%s5133_s13] sm:$0xff]  }
 0x51a   : > { %3775 = vmatmul.mubr.bf16.vlgmr.msra.gmra.mrb[28].mxu0 %v1924_v24  ;;  %v3354_v24 = vld [vmem:[%s5130_s10] ss:$0 sm:$0xff] }
 0x51b   : > { %2540 = vmatpush1.bf16.msra.mxu0 %v4011_v26  ;;  %2527 = vmatpush1.bf16.msra.mxu1 %v4092_v3  ;;  %v4109_v3 = vld [vmem:[%s5133_s13 + $0xc8] sm:$0xff]  }
 0x51c   : > { %2541 = vmatprep.subr.bf16.mxu0 %v4019_v27  ;;  %2528 = vmatprep.subr.bf16.mxu1 %v4100_v62  ;;  %v4111_v62 = vld [vmem:[%s5133_s13 + $0x88] sm:$0xff]  }
 0x51f   : > { %2542 = vmatpush1.bf16.msra.mxu0 %v4017_v28  ;;  %2529 = vmatpush1.bf16.msra.mxu1 %v4098_v20  ;;  %v4113_v20 = vld [vmem:[%s5133_s13 + $0xd0] sm:$0xff]  }
 0x520   : > { %2543 = vmatprep.subr.bf16.mxu0 %v4025_v30  ;;  %3617 = vmatprep.subr.bf16.mxu1 %v4104_v22  ;;  %v3363_v30 = vld [vmem:[%s5130_s10 + $0x1] ss:$0 sm:$0xff]  ;;  %v4115_v22 = vld [vmem:[%s5133_s13 + $0x90] sm:$0xff]  }
 0x523   : > { %2544 = vmatpush1.bf16.msra.mxu0 %v4023_v32 }
 0x524   : > { %2545 = vmatprep.subr.bf16.mxu0 %v4031_v34 }
 0x527   : > { %2546 = vmatpush1.bf16.msra.mxu0 %v4029_v36 }
 0x528   : > { %2547 = vmatprep.subr.bf16.mxu0 %v4037_v38 }
 0x52b   : > { %2548 = vmatpush1.bf16.msra.mxu0 %v4035_v40 }
 0x52c   : > { %2549 = vmatprep.subr.bf16.mxu0 %v4043_v42 }
 0x52f   : > { %2550 = vmatpush1.bf16.msra.mxu0 %v4041_v44 }
 0x530   : > { %2551 = vmatprep.subr.bf16.mxu0 %v4049_v46 }
 0x533   : > { %2552 = vmatpush1.bf16.msra.mxu0 %v4047_v48 }
 0x534   : > { %2553 = vmatprep.subr.bf16.mxu0 %v4055_v50 }
 0x537   : > { %2554 = vmatpush1.bf16.msra.mxu0 %v4053_v52 }
 0x538   : > { %2555 = vmatprep.subr.bf16.mxu0 %v4061_v54 }
 0x53b   : > { %2556 = vmatpush1.bf16.msra.mxu0 %v4059_v56 }
 0x53c   : > { %2557 = vmatprep.subr.bf16.mxu0 %v4067_v58 }
 0x53f   : > { %2558 = vmatpush1.bf16.msra.mxu0 %v4065_v60 }
 0x540   : > { %2559 = vmatprep.subr.bf16.mxu0 %v4073_v63 }
 0x543   : > { %2560 = vmatpush1.bf16.msra.mxu0 %v4071_v5 }
 0x544   : > { %2561 = vmatprep.subr.bf16.mxu0 %v4079_v8 }
 0x547   : > { %2562 = vmatpush1.bf16.msra.mxu0 %v4077_v9 }
 0x548   : > { %2563 = vmatprep.subr.bf16.mxu0 %v4085_v11 }
 0x54b   : > { %2564 = vmatpush1.bf16.msra.mxu0 %v4083_v13 }
 0x54c   : > { %2565 = vmatprep.subr.bf16.mxu0 %v4091_v14 }
 0x54f   : > { %2566 = vmatpush1.bf16.msra.mxu0 %v4089_v2  ;;  %v4107_v2 = vld [vmem:[%s5133_s13 + $0x80] sm:$0xff]  }
 0x550   : > { %2567 = vmatprep.subr.bf16.mxu0 %v4097_v17  ;;  %v4108_v17 = vld [vmem:[%s5133_s13 + $0x48] sm:$0xff]  }
 0x553   : > { %2568 = vmatpush1.bf16.msra.mxu0 %v4095_v18  ;;  %v4110_v18 = vld [vmem:[%s5133_s13 + $0x8] sm:$0xff]  }
 0x554   : > { %2569 = vmatprep.subr.bf16.mxu0 %v4103_v19  ;;  %v4112_v19 = vld [vmem:[%s5133_s13 + $0x50] sm:$0xff]  }
 0x557   : > { %2570 = vmatpush1.bf16.msra.mxu0 %v4101_v21  ;;  %v4114_v21 = vld [vmem:[%s5133_s13 + $0x10] sm:$0xff]  }
 0x558   : > { %3639 = vmatprep.subr.bf16.mxu0 %v4105_v23  ;;  %v4116_v23 = vld [vmem:[%s5133_s13 + $0x58] sm:$0xff]  }
 0x5ed   : > { %v3776_v25 = vpop.f32.mrb[28].mxu0 }
 0x5ee   : > { %v2037_v26 = vadd.f32 %v3776_v25, %v3354_v24  ;;  %v2028_v27 = vpop.f32.mrb[29].mxu0  ;;  %v4118_v25 = vld [vmem:[%s5133_s13 + $0x18] sm:$0xff]  }
 0x5ef   : > { %v2029_v28 = vadd.f32 %v3354_v24, %v2028_v27  ;;  %v3777_v29 = vpop.f32.mrb[30].mxu0  ;;  %v4120_v27 = vld [vmem:[%s5133_s13 + $0x60] sm:$0xff]  }
 0x5f0   : > { %v2040_v31 = vadd.f32 %v3777_v29, %v3354_v24  ;;  %v2031_v32 = vpop.f32.mrb[31].mxu0  ;;  %v2045_v33 = vmax.f32 %v2037_v26, 0.0  ;;  %v4119_v26 = vld [vmem:[%s5133_s13 + $0x98] sm:$0xff]   ;;  %v4122_v29 = vld [vmem:[%s5133_s13 + $0x20] sm:$0xff]  }
 0x5f1   : > { %v2043_v34 = vmax.f32 %v2029_v28, 0.0  ;;  %v2032_v35 = vadd.f32 %v3354_v24, %v2031_v32  ;;  %v4117_v24 = vld [vmem:[%s5133_s13 + $0xd8] sm:$0xff]   ;;  %v4121_v28 = vld [vmem:[%s5133_s13 + $0xe0] sm:$0xff]   ;;  %v4125_v32 = vld [vmem:[%s5133_s13 + $0xe8] sm:$0xff]  }
 0x5f2   : > { %v2046_v37 = vmax.f32 %v2040_v31, 0.0  ;;  %v2054_v39 = vadd.f32 %v3363_v30, %v2045_v33  ;;  %v4124_v31 = vld [vmem:[%s5133_s13 + $0x68] sm:$0xff]  }
 0x5f3   : > { %v2052_v36 = vadd.f32 %v3363_v30, %v2043_v34  ;;  %v2044_v38 = vmax.f32 %v2032_v35, 0.0  ;;  %v4126_v33 = vld [vmem:[%s5133_s13 + $0x28] sm:$0xff]   ;;  %v4128_v35 = vld [vmem:[%s5133_s13 + $0x70] sm:$0xff]  }
 0x5f4   : > { %v2055_v42 = vadd.f32 %v3363_v30, %v2046_v37  ;;  %v2067_v45 = vmul.f32 %v2054_v39, %v2054_v39  ;;  %v4127_v34 = vld [vmem:[%s5133_s13 + $0xa8] sm:$0xff]   ;;  %v4130_v37 = vld [vmem:[%s5133_s13 + $0x30] sm:$0xff]  }
 0x5f5   : > { %v2053_v40 = vadd.f32 %v3363_v30, %v2044_v38  ;;  %v2065_v41 = vmul.f32 %v2052_v36, %v2052_v36  ;;  %v4123_v30 = vld [vmem:[%s5133_s13 + $0xa0] sm:$0xff]   ;;  %v4131_v38 = vld [vmem:[%s5133_s13 + $0xb0] sm:$0xff]  }
 0x5f6   : > { %v2068_v48 = vmul.f32 %v2055_v42, %v2055_v42 }
 0x5f7   : > { %v2056_v43 = vadd.f32 %v2053_v40, %v2052_v36  ;;  %v2066_v44 = vmul.f32 %v2053_v40, %v2053_v40  ;;  %v4129_v36 = vld [vmem:[%s5133_s13 + $0xf0] sm:$0xff]   ;;  %v4133_v40 = vld [vmem:[%s5133_s13 + $0xf8] sm:$0xff]  }
 0x5f9   : > { %v2057_v46 = vadd.f32 %v2056_v43, %v2054_v39  ;;  %v2069_v47 = vadd.f32 %v2066_v44, %v2065_v41  ;;  %v4132_v39 = vld [vmem:[%s5133_s13 + $0x78] sm:$0xff]   ;;  %v2478_v43 = vlaneseq }
 0x5fa   : > { %v4134_v41 = vld [vmem:[%s5133_s13 + $0x38] sm:$0xff]  }
 0x5fb   : > { %v2058_v49 = vadd.f32 %v2057_v46, %v2055_v42  ;;  %v2070_v50 = vadd.f32 %v2069_v47, %v2067_v45  ;;  %v4135_v42 = vld [vmem:[%s5133_s13 + $0xb8] sm:$0xff]   ;;  %v2479_v44 = vshrl.u32 %v2478_v43, 7  ;;  %v2156_v47 = vld [vmem:[%s5132_s12] ss:$2 sm:$0xf] }
 0x5fd   : > { %v2059_v51 = vrot.slane %v2058_v49, 4  ;;  %v2071_v52 = vadd.f32 %v2070_v50, %v2068_v48  ;;  %v2480_v45 = vsub.s32 0, %v2479_v44  ;;  %v2488_v46 = vsub.s32 2, %v2479_v44 }
 0x5fe   : > { %v2484_v48 = vsub.s32 1, %v2479_v44 }
 0x5ff   : > { %v2060_v53 = vadd.f32 %v2059_v51, %v2058_v49  ;;  %v2072_v54 = vrot.slane %v2071_v52, 4  ;;  %v2492_v49 = vsub.s32 3, %v2479_v44  ;;  %v2481_v50 = vrot.slane %v2156_v47, %v2480_v45 }
 0x600   : > { %v2489_v51 = vrot.slane %v2156_v47, %v2488_v46 }
 0x601   : > { %v2061_v55 = vrot.slane %v2060_v53, 2  ;;  %v2073_v56 = vadd.f32 %v2072_v54, %v2071_v52  ;;  %v3428_v52 = vld [vmem:[%s5132_s12 + $0x1] ss:$2 sm:$0xf]  ;;  %v2493_v54 = vrot.slane %v2156_v47, %v2492_v49 }
 0x603   : > { %v2062_v57 = vadd.f32 %v2061_v55, %v2060_v53  ;;  %v2074_v58 = vrot.slane %v2073_v56, 2  ;;  %v2485_v53 = vrot.slane %v2156_v47, %v2484_v48 }
 0x605   : > { %v2063_v59 = vrot.slane %v2062_v57, 1  ;;  %v2075_v60 = vadd.f32 %v2074_v58, %v2073_v56  ;;  %v2590_v58 = vrot.slane %v3428_v52, %v2480_v45 }
 0x607   : > { %v2064_v61 = vadd.f32 %v2063_v59, %v2062_v57  ;;  %v2076_v63 = vrot.slane %v2075_v60, 1 }
 0x609   : > { %v2078_v4 = vmul.f32 0.03125, %v2064_v61  ;;  %v2077_v5 = vadd.f32 %v2076_v63, %v2075_v60  ;;  %v2598_v60 = vrot.slane %v3428_v52, %v2488_v46 }
 0x60b   : > { %v2079_v7 = vmul.f32 %v2078_v4, %v2064_v61  ;;  %v2090_v16 = vpack.c.bf16 %v2078_v4, %v2078_v4 }
 0x60d   : > { %v2080_v8 = vsub.f32 %v2077_v5, %v2079_v7  ;;  %v2594_v5 = vrot.slane %v3428_v52, %v2484_v48 }
 0x60f   : > { %v2081_v6 = vmul.f32 0.032258064, %v2080_v8  ;;  %v2602_v8 = vrot.slane %v3428_v52, %v2492_v49 }
 0x611   : > { %v2082_v9 = vmax.f32 %v2081_v6, 0.0 }
 0x613   : > { %4144 = vrsqrt.f32 %v2082_v9  ;;  %vm2085_vm7 = vcmp.eq.f32.partialorder %v2082_v9, inf  ;;  %v2088_v12 = vand.u32 2147483648, %v2082_v9  ;;  %vm2087_vm8 = vcmp.eq.f32.partialorder %v2082_v9, 0.0 }
 0x61d   : > { %v4145_v10 = vpop.eup %4144 }
 0x61e   : > { %v2084_v11 = vmul.f32 %v4145_v10, %v2082_v9 }
 0x620   : > { %v2086_v13 = vsel %vm2085_vm7, %v2082_v9, %v2084_v11 }
 0x621   : > { %v2089_v1 = vsel %vm2087_vm8, %v2088_v12, %v2086_v13 }
 0x622   : > { %v2091_v14 = vpack.c.bf16 %v2089_v1, %v2089_v1 }
 0x624   : > { %2530 = vmatprep.mubr.bf16.mxu1 %v2091_v14  ;;  %2571 = vmatprep.mubr.bf16.mxu0 %v2091_v14 }
 0x625   : > { %2531 = vmatmul.mubr.bf16.vlgmr.msra.gmra.mrb[36].mxu1 %v2090_v16  ;;  %2572 = vmatmul.mubr.bf16.vlgmr.msra.gmra.mrb[32].mxu0 %v2090_v16 }
 0x626   : > { %3618 = vmatpush3.bf16.msra.mxu1 %v4106_v15  ;;  %3640 = vmatpush3.bf16.msra.mxu0 %v4107_v2 }
 0x627   : > { %3619 = vmatprep.subr.bf16.mxu1 %v4108_v17  ;;  %3641 = vmatprep.subr.bf16.mxu0 %v4109_v3 }
 0x62a   : > { %3620 = vmatpush3.bf16.msra.mxu1 %v4110_v18  ;;  %3642 = vmatpush3.bf16.msra.mxu0 %v4111_v62  ;;  %v4136_v62 = vld [vmem:[#allocation13] sm:$0xff]  }
 0x62b   : > { %3621 = vmatprep.subr.bf16.mxu1 %v4112_v19  ;;  %3643 = vmatprep.subr.bf16.mxu0 %v4113_v20 }
 0x62e   : > { %3622 = vmatpush3.bf16.msra.mxu1 %v4114_v21  ;;  %3644 = vmatpush3.bf16.msra.mxu0 %v4115_v22  ;;  %v4137_v21 = vld [vmem:[#allocation13 + $0x8] sm:$0xff]   ;;  %v4138_v22 = vld [vmem:[#allocation13 + $0x10] sm:$0xff]  }
 0x62f   : > { %3623 = vmatprep.subr.bf16.mxu1 %v4116_v23  ;;  %3645 = vmatprep.subr.bf16.mxu0 %v4117_v24  ;;  %v4139_v23 = vld [vmem:[#allocation13 + $0x18] sm:$0xff]   ;;  %v4140_v24 = vld [vmem:[#allocation13 + $0x20] sm:$0xff]  }
 0x632   : > { %3624 = vmatpush3.bf16.msra.mxu1 %v4118_v25  ;;  %3646 = vmatpush3.bf16.msra.mxu0 %v4119_v26  ;;  %v4141_v25 = vld [vmem:[#allocation13 + $0x28] sm:$0xff]   ;;  %v4142_v26 = vld [vmem:[#allocation13 + $0x30] sm:$0xff]  }
 0x633   : > { %3625 = vmatprep.subr.bf16.mxu1 %v4120_v27  ;;  %3647 = vmatprep.subr.bf16.mxu0 %v4121_v28  ;;  %v4143_v27 = vld [vmem:[#allocation13 + $0x38] sm:$0xff]  }
 0x636   : > { %3626 = vmatpush3.bf16.msra.mxu1 %v4122_v29  ;;  %3648 = vmatpush3.bf16.msra.mxu0 %v4123_v30  ;;  %v2679_v30 = vld [vmem:[%s5200_s29] sm:$0x1] }
 0x637   : > { %3627 = vmatprep.subr.bf16.mxu1 %v4124_v31  ;;  %3649 = vmatprep.subr.bf16.mxu0 %v4125_v32 }
 0x63a   : > { %3628 = vmatpush3.bf16.msra.mxu1 %v4126_v33  ;;  %3650 = vmatpush3.bf16.msra.mxu0 %v4127_v34 }
 0x63b   : > { %3629 = vmatprep.subr.bf16.mxu1 %v4128_v35  ;;  %3651 = vmatprep.subr.bf16.mxu0 %v4129_v36 }
 0x63e   : > { %3630 = vmatpush3.bf16.msra.mxu1 %v4130_v37  ;;  %3652 = vmatpush3.bf16.msra.mxu0 %v4131_v38 }
 0x63f   : > { %3631 = vmatprep.subr.bf16.mxu1 %v4132_v39  ;;  %3653 = vmatprep.subr.bf16.mxu0 %v4133_v40  ;;  %v2953_v40 = vld [vmem:[%s5201_s14 + $0x1] sm:$0x1] }
 0x642   : > { %3632 = vmatpush3.bf16.msra.mxu1 %v4134_v41  ;;  %3654 = vmatpush3.bf16.msra.mxu0 %v4135_v42 }
 0x643   : > { %3778 = vmatprep.subr.bf16.mxu1 %v4465_v0 }
 0x6f8   : > { %v2532_v55 = vpop.f32.mrb[36].mxu1  ;;  %v2573_v56 = vpop.f32.mrb[32].mxu0 }
 0x6f9   : > { %v2533_v57 = vadd.f32 %v2532_v55, %v2481_v50  ;;  %v2574_v59 = vadd.f32 %v2573_v56, %v2489_v51  ;;  %v2534_v61 = vpop.f32.mrb[37].mxu1  ;;  %v2575_v63 = vpop.f32.mrb[33].mxu0 }
 0x6fa   : > { %v2535_v4 = vadd.f32 %v2534_v61, %v2485_v53  ;;  %v2576_v7 = vadd.f32 %v2575_v63, %v2493_v54  ;;  %v2536_v6 = vpop.f32.mrb[38].mxu1  ;;  %v2577_v9 = vpop.f32.mrb[34].mxu0 }
 0x6fb   : > { %v2580_v10 = vmax.f32 %v2533_v57, 0.0  ;;  %v2582_v11 = vmax.f32 %v2574_v59, 0.0  ;;  %v2537_v12 = vpop.f32.mrb[39].mxu1  ;;  %v2578_v13 = vpop.f32.mrb[35].mxu0 }
 0x6fc   : > { %v2581_v1 = vmax.f32 %v2535_v4, 0.0  ;;  %v2583_v14 = vmax.f32 %v2576_v7, 0.0 }
 0x6fd   : > { %v2607_v15 = vadd.f32 %v2590_v58, %v2580_v10  ;;  %v2609_v2 = vadd.f32 %v2598_v60, %v2582_v11 }
 0x6fe   : > { %v2608_v16 = vadd.f32 %v2594_v5, %v2581_v1  ;;  %v2610_v17 = vadd.f32 %v2602_v8, %v2583_v14 }
 0x6ff   : > { %v2611_v19 = vpack.c.bf16 %v2607_v15, %v2607_v15  ;;  %v2613_v20 = vpack.c.bf16 %v2609_v2, %v2609_v2 }
 0x700   : > { %v2612_v3 = vpack.c.bf16 %v2608_v16, %v2608_v16  ;;  %v2614_v18 = vpack.c.bf16 %v2610_v17, %v2610_v17 }
 0x702   : > { %2904 = vmatprep.mubr.bf16.mxu1 %v2612_v3  ;;  %2944 = vmatprep.mubr.bf16.mxu0 %v2614_v18 }
 0x703   : > { %2905 = vmatmul.mubr.bf16.vlgmr.msra.gmra.mrb[40].mxu1 %v2611_v19  ;;  %2945 = vmatmul.mubr.bf16.vlgmr.msra.gmra.mrb[36].mxu0 %v2613_v20 }
 0x704   : > { %3779 = vmatpush3.bf16.msra.mxu1 %v4136_v62  ;;  %3794 = vmatprep.mubr.msk.bf16.mxu1 %vm4467_vm2, %v4465_v0 }
 0x705   : > { %3780 = vmatprep.subr.bf16.mxu1 %v4465_v0 }
 0x708   : > { %3781 = vmatpush3.bf16.msra.mxu1 %v4137_v21 }
 0x709   : > { %3782 = vmatprep.subr.bf16.mxu1 %v4465_v0 }
 0x70c   : > { %3783 = vmatpush3.bf16.msra.mxu1 %v4138_v22 }
 0x70d   : > { %3784 = vmatprep.subr.bf16.mxu1 %v4465_v0 }
 0x710   : > { %3785 = vmatpush3.bf16.msra.mxu1 %v4139_v23 }
 0x711   : > { %3786 = vmatprep.subr.bf16.mxu1 %v4465_v0 }
 0x714   : > { %3787 = vmatpush3.bf16.msra.mxu1 %v4140_v24 }
 0x715   : > { %3788 = vmatprep.subr.bf16.mxu1 %v4465_v0 }
 0x718   : > { %3789 = vmatpush3.bf16.msra.mxu1 %v4141_v25 }
 0x719   : > { %3790 = vmatprep.subr.bf16.mxu1 %v4465_v0 }
 0x71c   : > { %3791 = vmatpush3.bf16.msra.mxu1 %v4142_v26 }
 0x71d   : > { %3792 = vmatprep.subr.bf16.mxu1 %v4465_v0 }
 0x720   : > { %3793 = vmatpush3.bf16.msra.mxu1 %v4143_v27 }
 0x7d6   : > { %v3633_v28 = vpop.f32.mrb[40].mxu1  ;;  %v3655_v29 = vpop.f32.mrb[36].mxu0 }
 0x7d7   : > { %v3634_v31 = vpop.f32.mrb[41].mxu1  ;;  %v3656_v32 = vpop.f32.mrb[37].mxu0 }
 0x7d8   : > { %v3635_v33 = vadd.f32 %v3634_v31, %v3633_v28  ;;  %v3657_v34 = vadd.f32 %v3656_v32, %v3655_v29  ;;  %v3636_v35 = vpop.f32.mrb[42].mxu1  ;;  %v3658_v36 = vpop.f32.mrb[38].mxu0 }
 0x7d9   : > { %v3637_v37 = vpop.f32.mrb[43].mxu1  ;;  %v3659_v38 = vpop.f32.mrb[39].mxu0 }
 0x7da   : > { %v2907_v0 = vadd.f32 %v3635_v33, %v2679_v30 }
 0x7dc   : > { %v2947_v39 = vadd.f32 %v3657_v34, %v2907_v0 }
 0x7de   : > { %v2952_v41 = vmax.f32 %v2947_v39, 0.0 }
 0x7e0   : > { %v2954_v42 = vadd.f32 %v2953_v40, %v2952_v41 }
 0x7e2   : > { %v2955_v43 = vpack.c.bf16 %v2954_v42, %v2954_v42  ;;  %3061 = vst [vmem:[%s679_s25] sm:$0x1] %v2954_v42 }
 0x7e4   : > { %3795 = vmatmul.mubr.bf16.vlgmr.msra.gmra.mrb[44].mxu1 %v2955_v43 }
 0x7e5   : > { %4355 = shalt.err (!%p4352_p2)
}
 0x7e6   : > { %s4356_s29 = scalar_lea.hbm %s5048_s19, 16  ;;  %s4360_s25 = scalar_lea.hbm %s5203_s24, 32 }
 0x7e7   : > { %p4357_p3 = scmp.ne.s32.totalorder %s5048_s19, %s4356_s29  ;;  %p4361_p7 = scmp.lt.u32.totalorder %s5048_s19, %s5203_s24 }
 0x7e8   : > { %p4362_p8 = scmp.lt.u32.totalorder %s4360_s25, %s4356_s29  ;;  %p4364_p13 = scmp.lt.u32.totalorder %s4356_s29, %s5048_s19 }
 0x7e9   : > { %p4358_p4 = pnand %p4357_p3, %p5204_p1 }
 0x7ea   : > { %p4363_p11 = por %p4362_p8, %p4361_p7 }
 0x7eb   : > { %p4359_p12 = pneg %p4358_p4 }
 0x7ec   : > { %p4365_p6 = por %p4364_p13, %p4363_p11 }
 0x7ee   : > { %p4366_p9 = pnand %p4365_p6, %p4359_p12 }
 0x7f0   : > { %4369 = shalt.err (!%p4366_p9)
}
 0x7f1   : > { %3828 = dma.vmem_to_hbm [thread:$0]  (%p5204_p1), %s3094_s3, 16, %s5048_s19, %s3068_s27  }
 0x7f2   : > { %s5205_s23 = sld [smem:[#allocation37_spill]]  ;;  %s673_s30 = scalar_lea.vmem [#allocation14], %s5036_s16 }
 0x7f3   : > { %s3080_s18 = sshll.u32 %s673_s30, 4  ;;  %s5206_s25 = sld [smem:[#allocation38_spill]]  ;;  %s5079_s18 = int_to_ptr.vmem [resolvable:$true] %s3080_s18 }
 0x7f4   : > { %s3064_s19 = scalar_lea.sflag [#allocation4], %s5036_s16  ;;  %s4370_s3 = scalar_lea.vmem %s5079_s18, 16 }
 0x7f5   : > { %p4371_p5 = scmp.ne.s32.totalorder %s5079_s18, %s4370_s3  ;;  %s4469_s0 = smov [#allocation14]  }
 0x7f6   : > { %s4374_s27 = sshll.u32 %s4469_s0, 4  ;;  %s4375_s27 = int_to_ptr.vmem [resolvable:$false] %s4374_s27 }
 0x7f7   : > { %p4372_p0 = pnand %p4371_p5, %p5204_p1  ;;  %s4376_s17 = scalar_lea.vmem %s4375_s27, 32 }
 0x7f8   : > { %v2972_v44 = vld [vmem:[%s5205_s23] sm:$0x1]  ;;  %p4377_p2 = scmp.lt.s32.totalorder %s5079_s18, %s4375_s27  ;;  %p4378_p3 = scmp.lt.s32.totalorder %s4376_s17, %s4370_s3 }
 0x7f9   : > { %s5077_s22 = scalar_lea.hbm %s5206_s25, %s3469_s7  ;;  %p4373_p10 = pneg %p4372_p0 }
 0x7fa   : > { %p4379_p4 = por %p4378_p3, %p4377_p2 }
 0x7fc   : > { %p4380_p12 = pnand %p4379_p4, %p4373_p10 }
 0x8b7   : > { %v3055_v45 = vpop.f32.mrb[44].mxu1 }
 0x8b8   : > { %v3056_v46 = vadd.f32 %v3055_v45, %v2972_v44  ;;  %v3796_v47 = vpop.f32.mrb[45].mxu1 }
 0x8b9   : > { %v3058_v48 = vpop.f32.mrb[46].mxu1 }
 0x8ba   : > { %3062 = vst [vmem:[%s673_s30] sm:$0x1] %v3056_v46  ;;  %v3797_v49 = vpop.f32.mrb[47].mxu1 }
 0x8bb   : > { %4383 = shalt.err (!%p4380_p12)
}
 0x8bc   : > { %s4384_s16 = scalar_lea.hbm %s5077_s22, 16  ;;  %s4388_s20 = scalar_lea.hbm %s5206_s25, 32 }
 0x8bd   : > { %p4385_p7 = scmp.ne.s32.totalorder %s5077_s22, %s4384_s16  ;;  %p4389_p13 = scmp.lt.u32.totalorder %s5077_s22, %s5206_s25 }
 0x8be   : > { %p4390_p6 = scmp.lt.u32.totalorder %s4388_s20, %s4384_s16  ;;  %p4392_p5 = scmp.lt.u32.totalorder %s4384_s16, %s5077_s22 }
 0x8bf   : > { %p4386_p8 = pnand %p4385_p7, %p5204_p1 }
 0x8c0   : > { %p4391_p9 = por %p4390_p6, %p4389_p13 }
 0x8c1   : > { %p4387_p11 = pneg %p4386_p8 }
 0x8c2   : > { %p4393_p0 = por %p4392_p5, %p4391_p9 }
 0x8c4   : > { %p4394_p10 = pnand %p4393_p0, %p4387_p11 }
 0x8c6   : > { %4397 = shalt.err (!%p4394_p10)
}
 0x8c7   : > { %3827 = dma.vmem_to_hbm [thread:$0]  (%p5204_p1), %s5079_s18, 16, %s5077_s22, %s3064_s19  }
 0x8c8 PF: > { %s5207_s29 = sld [smem:[#allocation26_spill]]  ;;  %s5208_s2 = sld [smem:[#allocation23_spill]] }
 0x8c9   : > { %s5209_s3 = sld [smem:[#allocation30_spill]] }
 0x8ce   : > { %p3874_p2 = scmp.ge.s32.totalorder %s5207_s29, 2  ;;  %s3105_s0 = sand.u32 1, %s5208_s2  }
 0x8cf   : > { %p5210_p3 = scmp.ne.s32.totalorder %s5209_s3, 0  ;;  %s3106_s27 = scalar_lea.sflag [#allocation4], %s3105_s0 }
 0x8d1   : > { %p3854_p4 = pnand %p3874_p2, %p5210_p3 }
 0x8d3   : > { %4431 = dma.done.wait (!%p3854_p4), %s3106_s27, 16  }
 0x8d4   : > { %4433 = vsyncadd (!%p3854_p4), %s3106_s27, 4294967280  ;;  %s3114_s17 = scalar_lea.sflag [#allocation16], %s3105_s0 }
 0x8d5   : > { %4435 = dma.done.wait (!%p3854_p4), %s3114_s17, 16  }
 0x8d6   : > { %4437 = vsyncadd (!%p3854_p4), %s3114_s17, 4294967280  ;;  %s5211_s30 = sld [smem:[#allocation27_spill]]  ;;  %s5212_s27 = sld [smem:[#allocation24_spill]] }
 0x8d7   : > { %s5213_s28 = sld [smem:[#allocation25_spill]]  ;;  %s5214_s29 = sld [smem:[#allocation28_spill]] }
 0x8dc   : > { %p36_p1 = scmp.ge.s32.totalorder %s5211_s30, 4  }
 0x8de   :  { %38 = sbr.rel (!%p36_p1) target bundleno = 19 (0x13), region = 170 }
 0x8e5   :  { %3118 = vsyncpa [#allocation3], 1 }
 0x8e6   :  { %3120 = vsyncpa [#allocation3 + $0x1], 1 }
 0x8e7   :  { %3121 = vsyncpa [#allocation6], 1 }
 0x8e8   :  { %3122 = vsyncpa [#allocation9], 1 }
 0x8e9   :  { %3123 = vsyncpa [#allocation12], 1 }
 0x8ea   :  { %3124 = vsyncpa [#allocation4], 1 }
 0x8eb   :  { %3126 = vsyncpa [#allocation4 + $0x1], 1 }
 0x8ec   :  { %3127 = vsyncpa [#allocation16], 1 }
 0x8ed   :  { %3129 = vsyncpa [#allocation16 + $0x1], 1 }

</bundles_post_ra>
